<compile_context>
chip_gen: v7x
topology: tpu7x:2x2x1
jax: 0.10.0
libtpu: 0.0.40
codegen_flags: <defaults>
</compile_context>

<pallas_src>
import jax
import jax.numpy as jnp
from jax.experimental import pallas as pl
from jax.experimental.pallas import tpu as pltpu


def attention_lstm_forward(x, A, Wx, Wh, Wattn, b):
    """x: (N, T, D), A: (N, H, 4, 4)  ->  h: (N, T, H)"""
    N, T, D = x.shape
    H = A.shape[1]
    P = A.shape[2] * A.shape[3]
    H4 = 4 * H

    # --- one-time layout plumbing in the wrapper ---------------------------
    x_tm = jnp.transpose(x, (1, 0, 2)).reshape(T * N, D).astype(jnp.float32)  # (T*N, D)
    A_nhp = A.reshape(N, H, P).astype(jnp.float32)                            # (N, H, P)
    A_nph = jnp.transpose(A_nhp, (0, 2, 1))                                   # (N, P, H)
    Wx32 = Wx.astype(jnp.float32)                                             # (D, 4H)
    Wh32 = Wh.astype(jnp.float32)                                             # (H, 4H)
    Wattn32 = Wattn.astype(jnp.float32)                                       # (H, 4H)
    b2 = b.reshape(1, H4).astype(jnp.float32)                                 # (1, 4H)

    scale = float(H) ** -0.5

    def kernel(x_ref, a_ref, at_ref, wx_ref, wh_ref, wattn_ref, b_ref,
               out_ref, xw_scr):
        A_hp = a_ref[...]        # (N, H, P)  -- context contraction (lane reduce over P)
        A_ph = at_ref[...]       # (N, P, H)  -- score contraction   (lane reduce over H)
        Wh_v = wh_ref[...]       # (H, 4H)
        Wattn_v = wattn_ref[...] # (H, 4H)

        # Hoisted input projection (+ bias): one big MXU op, off the serial
        # path, staged through VMEM so per-step access is a plain vld.
        xw_scr[...] = jnp.dot(x_ref[...], wx_ref[...],
                              preferred_element_type=jnp.float32) + b_ref[...]

        # h0 = c0 = mean-pooled projected feature map.
        h = jnp.mean(A_hp, axis=2)                                            # (N, H)
        c = h

        # Lane mask: sigmoid lanes (i|f|o, < 3H) vs tanh lanes (g, >= 3H).
        lane = jax.lax.broadcasted_iota(jnp.int32, (N, H4), 1)
        sig_mask = lane < 3 * H

        hs = []
        for t in range(T):                      # fully unrolled static loop
            # h @ Wh issued FIRST: the MXU push overlaps the softmax below.
            hWh = jnp.dot(h, Wh_v, preferred_element_type=jnp.float32)        # (N, 4H)
            xw_t = xw_scr[t * N:(t + 1) * N, :]                               # (N, 4H)

            # ---- scaled dot-product attention (lane-axis reductions) ------
            scores = jnp.sum(A_ph * h[:, None, :], axis=2) * scale            # (N, P)
            # No max-subtraction: scores are O(1)-bounded and softmax is
            # shift-invariant, so this matches the reference numerically.
            e = jnp.exp(scores)
            inv = pl.reciprocal(jnp.sum(e, axis=1, keepdims=True), approx=True)
            wgt = e * inv                                                     # (N, P)
            attn = jnp.sum(A_hp * wgt[:, None, :], axis=2)                    # (N, H)

            aWa = jnp.dot(attn, Wattn_v, preferred_element_type=jnp.float32)  # (N, 4H)
            a_gates = xw_t + hWh + aWa                                        # (N, 4H)

            # Single EUP pass: tanh(x) = 2*sigmoid(2x) - 1 on the g lanes.
            pre = jnp.where(sig_mask, a_gates, 2.0 * a_gates)
            s = jax.nn.sigmoid(pre)
            act = jnp.where(sig_mask, s, 2.0 * s - 1.0)

            i_g = act[:, 0 * H:1 * H]
            f_g = act[:, 1 * H:2 * H]
            o_g = act[:, 2 * H:3 * H]
            g_g = act[:, 3 * H:4 * H]

            c = f_g * c + i_g * g_g
            h = o_g * jnp.tanh(c)
            hs.append(h)

        # Single lane-dense (N, T*H) store after the loop (T*H = 256 lanes).
        out_ref[...] = jnp.concatenate(hs, axis=1).astype(out_ref.dtype)

    out2d = pl.pallas_call(
        kernel,
        out_shape=jax.ShapeDtypeStruct((N, T * H), jnp.float32),
        in_specs=[pl.BlockSpec(memory_space=pltpu.MemorySpace.VMEM)] * 7,
        out_specs=pl.BlockSpec(memory_space=pltpu.MemorySpace.VMEM),
        scratch_shapes=[pltpu.VMEM((T * N, H4), jnp.float32)],
    )(x_tm, A_nhp, A_nph, Wx32, Wh32, Wattn32, b2)

    return out2d.reshape(N, T, H)


def reference_forward(x, A, Wx, Wh, Wattn, b):
    """Pure-JAX reference that mirrors the PyTorch module exactly."""
    N, T, D = x.shape
    H = A.shape[1]
    A_t = A.reshape(N, H, -1)
    h = A_t.mean(axis=2)
    c = h
    outs = []
    for t in range(T):
        scores = jnp.einsum('nh,nhp->np', h, A_t) * (H ** -0.5)
        w = jax.nn.softmax(scores, axis=1)
        attn = jnp.einsum('nhp,np->nh', A_t, w)
        a = x[:, t] @ Wx + h @ Wh + attn @ Wattn + b
        i = jax.nn.sigmoid(a[:, :H])
        f = jax.nn.sigmoid(a[:, H:2 * H])
        o = jax.nn.sigmoid(a[:, 2 * H:3 * H])
        g = jnp.tanh(a[:, 3 * H:])
        c = f * c + i * g
        h = o * jnp.tanh(c)
        outs.append(h)
    return jnp.stack(outs, axis=1)


if __name__ == "__main__":
    N, T, D, H = 2, 8, 64, 32

    key = jax.random.PRNGKey(0)
    k1, k2, k3, k4, k5 = jax.random.split(key, 5)

    # Deterministic parameter init matching AttentionLSTM.__init__ shapes.
    Wx = jax.random.normal(k1, (D, 4 * H), dtype=jnp.float32) / jnp.sqrt(D)
    Wh = jax.random.normal(k2, (H, 4 * H), dtype=jnp.float32) / jnp.sqrt(H)
    Wattn = jax.random.normal(k3, (H, 4 * H), dtype=jnp.float32) / jnp.sqrt(H)
    b = jnp.zeros((4 * H,), dtype=jnp.float32)

    x = jax.random.normal(k4, (N, T, D), dtype=jnp.float32)
    A = jax.random.normal(k5, (N, H, 4, 4), dtype=jnp.float32)

    out = attention_lstm_forward(x, A, Wx, Wh, Wattn, b)
    out = jax.block_until_ready(out)

    ref = reference_forward(x, A, Wx, Wh, Wattn, b)
    assert out.shape == (N, T, H), out.shape
    assert jnp.allclose(out, ref, atol=1e-3, rtol=1e-3), \
        f"max abs err = {jnp.max(jnp.abs(out - ref))}"

    print("KERNEL_OK")
</pallas_src>

<mosaic_0001>
module attributes {stable_mosaic.version = 11 : i64} {
  func.func @kernel(%arg0: memref<16x64xf32, #tpu.memory_space<vmem>>, %arg1: memref<2x32x16xf32, #tpu.memory_space<vmem>>, %arg2: memref<2x16x32xf32, #tpu.memory_space<vmem>>, %arg3: memref<64x128xf32, #tpu.memory_space<vmem>>, %arg4: memref<32x128xf32, #tpu.memory_space<vmem>>, %arg5: memref<32x128xf32, #tpu.memory_space<vmem>>, %arg6: memref<1x128xf32, #tpu.memory_space<vmem>>, %arg7: memref<2x256xf32, #tpu.memory_space<vmem>>, %arg8: memref<16x128xf32, #tpu.memory_space<vmem>>) attributes {dimension_semantics = [], scalar_prefetch = 0 : i64, scratch_operands = 1 : i64, tpu.core_type = #tpu.core_type<tc>} {
    %c0 = arith.constant 0 : index
    %c0_0 = arith.constant 0 : index
    %c0_1 = arith.constant 0 : index
    %0 = vector.load %arg1[%c0, %c0_0, %c0_1] : memref<2x32x16xf32, #tpu.memory_space<vmem>>, vector<2x32x16xf32>
    %c0_2 = arith.constant 0 : index
    %c0_3 = arith.constant 0 : index
    %c0_4 = arith.constant 0 : index
    %1 = vector.load %arg2[%c0_2, %c0_3, %c0_4] : memref<2x16x32xf32, #tpu.memory_space<vmem>>, vector<2x16x32xf32>
    %c0_5 = arith.constant 0 : index
    %c0_6 = arith.constant 0 : index
    %2 = vector.load %arg4[%c0_5, %c0_6] : memref<32x128xf32, #tpu.memory_space<vmem>>, vector<32x128xf32>
    %c0_7 = arith.constant 0 : index
    %c0_8 = arith.constant 0 : index
    %3 = vector.load %arg5[%c0_7, %c0_8] : memref<32x128xf32, #tpu.memory_space<vmem>>, vector<32x128xf32>
    %c0_9 = arith.constant 0 : index
    %c0_10 = arith.constant 0 : index
    %4 = vector.load %arg0[%c0_9, %c0_10] : memref<16x64xf32, #tpu.memory_space<vmem>>, vector<16x64xf32>
    %c0_11 = arith.constant 0 : index
    %c0_12 = arith.constant 0 : index
    %5 = vector.load %arg3[%c0_11, %c0_12] : memref<64x128xf32, #tpu.memory_space<vmem>>, vector<64x128xf32>
    %cst = arith.constant dense<0.000000e+00> : vector<16x128xf32>
    %6 = tpu.matmul %4, %5, %cst {dimension_numbers = #tpu.dot_dimension_numbers<[1], [0], [0], [1], [0, 0, 1, 1], [], []>} : vector<16x64xf32>, vector<64x128xf32>, vector<16x128xf32> -> vector<16x128xf32>
    %c0_13 = arith.constant 0 : index
    %c0_14 = arith.constant 0 : index
    %7 = vector.load %arg6[%c0_13, %c0_14] : memref<1x128xf32, #tpu.memory_space<vmem>>, vector<1x128xf32>
    %8 = vector.broadcast %7 : vector<1x128xf32> to vector<16x128xf32>
    %9 = arith.addf %6, %8 : vector<16x128xf32>
    %c0_15 = arith.constant 0 : index
    %c0_16 = arith.constant 0 : index
    %10 = vector.load %arg8[%c0_15, %c0_16] : memref<16x128xf32, #tpu.memory_space<vmem>>, vector<16x128xf32>
    tpu.vector_store %arg8[%c0_15, %c0_16], %9 {strides = array<i32>} : memref<16x128xf32, #tpu.memory_space<vmem>>, vector<16x128xf32>,
    %cst_17 = arith.constant dense<0.000000e+00> : vector<2x32xf32>
    %11 = vector.multi_reduction <add>, %0, %cst_17 [2] : vector<2x32x16xf32> to vector<2x32xf32>
    %cst_18 = arith.constant 1.600000e+01 : f32
    %12 = vector.broadcast %cst_18 : f32 to vector<2x32xf32>
    %13 = arith.divf %11, %12 : vector<2x32xf32>
    %14 = tpu.iota {dimensions = array<i32: 1>} : vector<2x128xi32>
    %c96_i32 = arith.constant 96 : i32
    %15 = vector.broadcast %c96_i32 : i32 to vector<2x128xi32>
    %16 = arith.cmpi slt, %14, %15 : vector<2x128xi32>
    %cst_19 = arith.constant dense<0.000000e+00> : vector<2x128xf32>
    %17 = tpu.matmul %13, %2, %cst_19 {dimension_numbers = #tpu.dot_dimension_numbers<[1], [0], [0], [1], [0, 0, 1, 1], [], []>} : vector<2x32xf32>, vector<32x128xf32>, vector<2x128xf32> -> vector<2x128xf32>
    %c0_20 = arith.constant 0 : index
    %c0_21 = arith.constant 0 : index
    %18 = vector.load %arg8[%c0_20, %c0_21] : memref<16x128xf32, #tpu.memory_space<vmem>>, vector<2x128xf32>
    %19 = vector.shape_cast %13 : vector<2x32xf32> to vector<2x1x32xf32>
    %20 = vector.broadcast %19 : vector<2x1x32xf32> to vector<2x16x32xf32>
    %21 = arith.mulf %1, %20 : vector<2x16x32xf32>
    %cst_22 = arith.constant dense<0.000000e+00> : vector<2x16xf32>
    %22 = vector.multi_reduction <add>, %21, %cst_22 [2] : vector<2x16x32xf32> to vector<2x16xf32>
    %cst_23 = arith.constant 0.176776692 : f32
    %23 = vector.broadcast %cst_23 : f32 to vector<2x16xf32>
    %24 = arith.mulf %22, %23 : vector<2x16xf32>
    %25 = math.exp %24 : vector<2x16xf32>
    %cst_24 = arith.constant dense<0.000000e+00> : vector<2xf32>
    %26 = vector.multi_reduction <add>, %25, %cst_24 [1] : vector<2x16xf32> to vector<2xf32>
    %27 = vector.shape_cast %26 : vector<2xf32> to vector<2x1xf32>
    %28 = tpu.reciprocal %27 {approx = true} : vector<2x1xf32> -> vector<2x1xf32>
    %29 = vector.broadcast %28 : vector<2x1xf32> to vector<2x16xf32>
    %30 = arith.mulf %25, %29 : vector<2x16xf32>
    %31 = vector.shape_cast %30 : vector<2x16xf32> to vector<2x1x16xf32>
    %32 = vector.broadcast %31 : vector<2x1x16xf32> to vector<2x32x16xf32>
    %33 = arith.mulf %0, %32 : vector<2x32x16xf32>
    %cst_25 = arith.constant dense<0.000000e+00> : vector<2x32xf32>
    %34 = vector.multi_reduction <add>, %33, %cst_25 [2] : vector<2x32x16xf32> to vector<2x32xf32>
    %cst_26 = arith.constant dense<0.000000e+00> : vector<2x128xf32>
    %35 = tpu.matmul %34, %3, %cst_26 {dimension_numbers = #tpu.dot_dimension_numbers<[1], [0], [0], [1], [0, 0, 1, 1], [], []>} : vector<2x32xf32>, vector<32x128xf32>, vector<2x128xf32> -> vector<2x128xf32>
    %36 = arith.addf %18, %17 : vector<2x128xf32>
    %37 = arith.addf %36, %35 : vector<2x128xf32>
    %cst_27 = arith.constant 2.000000e+00 : f32
    %38 = vector.broadcast %cst_27 : f32 to vector<2x128xf32>
    %39 = arith.mulf %38, %37 : vector<2x128xf32>
    %40 = arith.select %16, %37, %39 : vector<2x128xi1>, vector<2x128xf32>
    %41 = arith.negf %40 : vector<2x128xf32>
    %42 = math.exp %41 : vector<2x128xf32>
    %cst_28 = arith.constant 1.000000e+00 : f32
    %43 = vector.broadcast %cst_28 : f32 to vector<2x128xf32>
    %44 = arith.addf %43, %42 : vector<2x128xf32>
    %45 = arith.divf %43, %44 : vector<2x128xf32>
    %cst_29 = arith.constant 2.000000e+00 : f32
    %46 = vector.broadcast %cst_29 : f32 to vector<2x128xf32>
    %47 = arith.mulf %46, %45 : vector<2x128xf32>
    %cst_30 = arith.constant 1.000000e+00 : f32
    %48 = vector.broadcast %cst_30 : f32 to vector<2x128xf32>
    %49 = arith.subf %47, %48 : vector<2x128xf32>
    %50 = arith.select %16, %45, %49 : vector<2x128xi1>, vector<2x128xf32>
    %51 = vector.extract_strided_slice %50 {offsets = [0, 0], sizes = [2, 32], strides = [1, 1]} : vector<2x128xf32> to vector<2x32xf32>
    %52 = vector.extract_strided_slice %50 {offsets = [0, 32], sizes = [2, 32], strides = [1, 1]} : vector<2x128xf32> to vector<2x32xf32>
    %53 = vector.extract_strided_slice %50 {offsets = [0, 64], sizes = [2, 32], strides = [1, 1]} : vector<2x128xf32> to vector<2x32xf32>
    %54 = vector.extract_strided_slice %50 {offsets = [0, 96], sizes = [2, 32], strides = [1, 1]} : vector<2x128xf32> to vector<2x32xf32>
    %55 = arith.mulf %52, %13 : vector<2x32xf32>
    %56 = arith.mulf %51, %54 : vector<2x32xf32>
    %57 = arith.addf %55, %56 : vector<2x32xf32>
    %58 = math.tanh %57 : vector<2x32xf32>
    %59 = arith.mulf %53, %58 : vector<2x32xf32>
    %cst_31 = arith.constant dense<0.000000e+00> : vector<2x128xf32>
    %60 = tpu.matmul %59, %2, %cst_31 {dimension_numbers = #tpu.dot_dimension_numbers<[1], [0], [0], [1], [0, 0, 1, 1], [], []>} : vector<2x32xf32>, vector<32x128xf32>, vector<2x128xf32> -> vector<2x128xf32>
    %c2 = arith.constant 2 : index
    %c0_32 = arith.constant 0 : index
    %61 = vector.load %arg8[%c2, %c0_32] : memref<16x128xf32, #tpu.memory_space<vmem>>, vector<2x128xf32>
    %62 = vector.shape_cast %59 : vector<2x32xf32> to vector<2x1x32xf32>
    %63 = vector.broadcast %62 : vector<2x1x32xf32> to vector<2x16x32xf32>
    %64 = arith.mulf %1, %63 : vector<2x16x32xf32>
    %cst_33 = arith.constant dense<0.000000e+00> : vector<2x16xf32>
    %65 = vector.multi_reduction <add>, %64, %cst_33 [2] : vector<2x16x32xf32> to vector<2x16xf32>
    %cst_34 = arith.constant 0.176776692 : f32
    %66 = vector.broadcast %cst_34 : f32 to vector<2x16xf32>
    %67 = arith.mulf %65, %66 : vector<2x16xf32>
    %68 = math.exp %67 : vector<2x16xf32>
    %cst_35 = arith.constant dense<0.000000e+00> : vector<2xf32>
    %69 = vector.multi_reduction <add>, %68, %cst_35 [1] : vector<2x16xf32> to vector<2xf32>
    %70 = vector.shape_cast %69 : vector<2xf32> to vector<2x1xf32>
    %71 = tpu.reciprocal %70 {approx = true} : vector<2x1xf32> -> vector<2x1xf32>
    %72 = vector.broadcast %71 : vector<2x1xf32> to vector<2x16xf32>
    %73 = arith.mulf %68, %72 : vector<2x16xf32>
    %74 = vector.shape_cast %73 : vector<2x16xf32> to vector<2x1x16xf32>
    %75 = vector.broadcast %74 : vector<2x1x16xf32> to vector<2x32x16xf32>
    %76 = arith.mulf %0, %75 : vector<2x32x16xf32>
    %cst_36 = arith.constant dense<0.000000e+00> : vector<2x32xf32>
    %77 = vector.multi_reduction <add>, %76, %cst_36 [2] : vector<2x32x16xf32> to vector<2x32xf32>
    %cst_37 = arith.constant dense<0.000000e+00> : vector<2x128xf32>
    %78 = tpu.matmul %77, %3, %cst_37 {dimension_numbers = #tpu.dot_dimension_numbers<[1], [0], [0], [1], [0, 0, 1, 1], [], []>} : vector<2x32xf32>, vector<32x128xf32>, vector<2x128xf32> -> vector<2x128xf32>
    %79 = arith.addf %61, %60 : vector<2x128xf32>
    %80 = arith.addf %79, %78 : vector<2x128xf32>
    %cst_38 = arith.constant 2.000000e+00 : f32
    %81 = vector.broadcast %cst_38 : f32 to vector<2x128xf32>
    %82 = arith.mulf %81, %80 : vector<2x128xf32>
    %83 = arith.select %16, %80, %82 : vector<2x128xi1>, vector<2x128xf32>
    %84 = arith.negf %83 : vector<2x128xf32>
    %85 = math.exp %84 : vector<2x128xf32>
    %cst_39 = arith.constant 1.000000e+00 : f32
    %86 = vector.broadcast %cst_39 : f32 to vector<2x128xf32>
    %87 = arith.addf %86, %85 : vector<2x128xf32>
    %88 = arith.divf %86, %87 : vector<2x128xf32>
    %cst_40 = arith.constant 2.000000e+00 : f32
    %89 = vector.broadcast %cst_40 : f32 to vector<2x128xf32>
    %90 = arith.mulf %89, %88 : vector<2x128xf32>
    %cst_41 = arith.constant 1.000000e+00 : f32
    %91 = vector.broadcast %cst_41 : f32 to vector<2x128xf32>
    %92 = arith.subf %90, %91 : vector<2x128xf32>
    %93 = arith.select %16, %88, %92 : vector<2x128xi1>, vector<2x128xf32>
    %94 = vector.extract_strided_slice %93 {offsets = [0, 0], sizes = [2, 32], strides = [1, 1]} : vector<2x128xf32> to vector<2x32xf32>
    %95 = vector.extract_strided_slice %93 {offsets = [0, 32], sizes = [2, 32], strides = [1, 1]} : vector<2x128xf32> to vector<2x32xf32>
    %96 = vector.extract_strided_slice %93 {offsets = [0, 64], sizes = [2, 32], strides = [1, 1]} : vector<2x128xf32> to vector<2x32xf32>
    %97 = vector.extract_strided_slice %93 {offsets = [0, 96], sizes = [2, 32], strides = [1, 1]} : vector<2x128xf32> to vector<2x32xf32>
    %98 = arith.mulf %95, %57 : vector<2x32xf32>
    %99 = arith.mulf %94, %97 : vector<2x32xf32>
    %100 = arith.addf %98, %99 : vector<2x32xf32>
    %101 = math.tanh %100 : vector<2x32xf32>
    %102 = arith.mulf %96, %101 : vector<2x32xf32>
    %cst_42 = arith.constant dense<0.000000e+00> : vector<2x128xf32>
    %103 = tpu.matmul %102, %2, %cst_42 {dimension_numbers = #tpu.dot_dimension_numbers<[1], [0], [0], [1], [0, 0, 1, 1], [], []>} : vector<2x32xf32>, vector<32x128xf32>, vector<2x128xf32> -> vector<2x128xf32>
    %c4 = arith.constant 4 : index
    %c0_43 = arith.constant 0 : index
    %104 = vector.load %arg8[%c4, %c0_43] : memref<16x128xf32, #tpu.memory_space<vmem>>, vector<2x128xf32>
    %105 = vector.shape_cast %102 : vector<2x32xf32> to vector<2x1x32xf32>
    %106 = vector.broadcast %105 : vector<2x1x32xf32> to vector<2x16x32xf32>
    %107 = arith.mulf %1, %106 : vector<2x16x32xf32>
    %cst_44 = arith.constant dense<0.000000e+00> : vector<2x16xf32>
    %108 = vector.multi_reduction <add>, %107, %cst_44 [2] : vector<2x16x32xf32> to vector<2x16xf32>
    %cst_45 = arith.constant 0.176776692 : f32
    %109 = vector.broadcast %cst_45 : f32 to vector<2x16xf32>
    %110 = arith.mulf %108, %109 : vector<2x16xf32>
    %111 = math.exp %110 : vector<2x16xf32>
    %cst_46 = arith.constant dense<0.000000e+00> : vector<2xf32>
    %112 = vector.multi_reduction <add>, %111, %cst_46 [1] : vector<2x16xf32> to vector<2xf32>
    %113 = vector.shape_cast %112 : vector<2xf32> to vector<2x1xf32>
    %114 = tpu.reciprocal %113 {approx = true} : vector<2x1xf32> -> vector<2x1xf32>
    %115 = vector.broadcast %114 : vector<2x1xf32> to vector<2x16xf32>
    %116 = arith.mulf %111, %115 : vector<2x16xf32>
    %117 = vector.shape_cast %116 : vector<2x16xf32> to vector<2x1x16xf32>
    %118 = vector.broadcast %117 : vector<2x1x16xf32> to vector<2x32x16xf32>
    %119 = arith.mulf %0, %118 : vector<2x32x16xf32>
    %cst_47 = arith.constant dense<0.000000e+00> : vector<2x32xf32>
    %120 = vector.multi_reduction <add>, %119, %cst_47 [2] : vector<2x32x16xf32> to vector<2x32xf32>
    %cst_48 = arith.constant dense<0.000000e+00> : vector<2x128xf32>
    %121 = tpu.matmul %120, %3, %cst_48 {dimension_numbers = #tpu.dot_dimension_numbers<[1], [0], [0], [1], [0, 0, 1, 1], [], []>} : vector<2x32xf32>, vector<32x128xf32>, vector<2x128xf32> -> vector<2x128xf32>
    %122 = arith.addf %104, %103 : vector<2x128xf32>
    %123 = arith.addf %122, %121 : vector<2x128xf32>
    %cst_49 = arith.constant 2.000000e+00 : f32
    %124 = vector.broadcast %cst_49 : f32 to vector<2x128xf32>
    %125 = arith.mulf %124, %123 : vector<2x128xf32>
    %126 = arith.select %16, %123, %125 : vector<2x128xi1>, vector<2x128xf32>
    %127 = arith.negf %126 : vector<2x128xf32>
    %128 = math.exp %127 : vector<2x128xf32>
    %cst_50 = arith.constant 1.000000e+00 : f32
    %129 = vector.broadcast %cst_50 : f32 to vector<2x128xf32>
    %130 = arith.addf %129, %128 : vector<2x128xf32>
    %131 = arith.divf %129, %130 : vector<2x128xf32>
    %cst_51 = arith.constant 2.000000e+00 : f32
    %132 = vector.broadcast %cst_51 : f32 to vector<2x128xf32>
    %133 = arith.mulf %132, %131 : vector<2x128xf32>
    %cst_52 = arith.constant 1.000000e+00 : f32
    %134 = vector.broadcast %cst_52 : f32 to vector<2x128xf32>
    %135 = arith.subf %133, %134 : vector<2x128xf32>
    %136 = arith.select %16, %131, %135 : vector<2x128xi1>, vector<2x128xf32>
    %137 = vector.extract_strided_slice %136 {offsets = [0, 0], sizes = [2, 32], strides = [1, 1]} : vector<2x128xf32> to vector<2x32xf32>
    %138 = vector.extract_strided_slice %136 {offsets = [0, 32], sizes = [2, 32], strides = [1, 1]} : vector<2x128xf32> to vector<2x32xf32>
    %139 = vector.extract_strided_slice %136 {offsets = [0, 64], sizes = [2, 32], strides = [1, 1]} : vector<2x128xf32> to vector<2x32xf32>
    %140 = vector.extract_strided_slice %136 {offsets = [0, 96], sizes = [2, 32], strides = [1, 1]} : vector<2x128xf32> to vector<2x32xf32>
    %141 = arith.mulf %138, %100 : vector<2x32xf32>
    %142 = arith.mulf %137, %140 : vector<2x32xf32>
    %143 = arith.addf %141, %142 : vector<2x32xf32>
    %144 = math.tanh %143 : vector<2x32xf32>
    %145 = arith.mulf %139, %144 : vector<2x32xf32>
    %cst_53 = arith.constant dense<0.000000e+00> : vector<2x128xf32>
    %146 = tpu.matmul %145, %2, %cst_53 {dimension_numbers = #tpu.dot_dimension_numbers<[1], [0], [0], [1], [0, 0, 1, 1], [], []>} : vector<2x32xf32>, vector<32x128xf32>, vector<2x128xf32> -> vector<2x128xf32>
    %c6 = arith.constant 6 : index
    %c0_54 = arith.constant 0 : index
    %147 = vector.load %arg8[%c6, %c0_54] : memref<16x128xf32, #tpu.memory_space<vmem>>, vector<2x128xf32>
    %148 = vector.shape_cast %145 : vector<2x32xf32> to vector<2x1x32xf32>
    %149 = vector.broadcast %148 : vector<2x1x32xf32> to vector<2x16x32xf32>
    %150 = arith.mulf %1, %149 : vector<2x16x32xf32>
    %cst_55 = arith.constant dense<0.000000e+00> : vector<2x16xf32>
    %151 = vector.multi_reduction <add>, %150, %cst_55 [2] : vector<2x16x32xf32> to vector<2x16xf32>
    %cst_56 = arith.constant 0.176776692 : f32
    %152 = vector.broadcast %cst_56 : f32 to vector<2x16xf32>
    %153 = arith.mulf %151, %152 : vector<2x16xf32>
    %154 = math.exp %153 : vector<2x16xf32>
    %cst_57 = arith.constant dense<0.000000e+00> : vector<2xf32>
    %155 = vector.multi_reduction <add>, %154, %cst_57 [1] : vector<2x16xf32> to vector<2xf32>
    %156 = vector.shape_cast %155 : vector<2xf32> to vector<2x1xf32>
    %157 = tpu.reciprocal %156 {approx = true} : vector<2x1xf32> -> vector<2x1xf32>
    %158 = vector.broadcast %157 : vector<2x1xf32> to vector<2x16xf32>
    %159 = arith.mulf %154, %158 : vector<2x16xf32>
    %160 = vector.shape_cast %159 : vector<2x16xf32> to vector<2x1x16xf32>
    %161 = vector.broadcast %160 : vector<2x1x16xf32> to vector<2x32x16xf32>
    %162 = arith.mulf %0, %161 : vector<2x32x16xf32>
    %cst_58 = arith.constant dense<0.000000e+00> : vector<2x32xf32>
    %163 = vector.multi_reduction <add>, %162, %cst_58 [2] : vector<2x32x16xf32> to vector<2x32xf32>
    %cst_59 = arith.constant dense<0.000000e+00> : vector<2x128xf32>
    %164 = tpu.matmul %163, %3, %cst_59 {dimension_numbers = #tpu.dot_dimension_numbers<[1], [0], [0], [1], [0, 0, 1, 1], [], []>} : vector<2x32xf32>, vector<32x128xf32>, vector<2x128xf32> -> vector<2x128xf32>
    %165 = arith.addf %147, %146 : vector<2x128xf32>
    %166 = arith.addf %165, %164 : vector<2x128xf32>
    %cst_60 = arith.constant 2.000000e+00 : f32
    %167 = vector.broadcast %cst_60 : f32 to vector<2x128xf32>
    %168 = arith.mulf %167, %166 : vector<2x128xf32>
    %169 = arith.select %16, %166, %168 : vector<2x128xi1>, vector<2x128xf32>
    %170 = arith.negf %169 : vector<2x128xf32>
    %171 = math.exp %170 : vector<2x128xf32>
    %cst_61 = arith.constant 1.000000e+00 : f32
    %172 = vector.broadcast %cst_61 : f32 to vector<2x128xf32>
    %173 = arith.addf %172, %171 : vector<2x128xf32>
    %174 = arith.divf %172, %173 : vector<2x128xf32>
    %cst_62 = arith.constant 2.000000e+00 : f32
    %175 = vector.broadcast %cst_62 : f32 to vector<2x128xf32>
    %176 = arith.mulf %175, %174 : vector<2x128xf32>
    %cst_63 = arith.constant 1.000000e+00 : f32
    %177 = vector.broadcast %cst_63 : f32 to vector<2x128xf32>
    %178 = arith.subf %176, %177 : vector<2x128xf32>
    %179 = arith.select %16, %174, %178 : vector<2x128xi1>, vector<2x128xf32>
    %180 = vector.extract_strided_slice %179 {offsets = [0, 0], sizes = [2, 32], strides = [1, 1]} : vector<2x128xf32> to vector<2x32xf32>
    %181 = vector.extract_strided_slice %179 {offsets = [0, 32], sizes = [2, 32], strides = [1, 1]} : vector<2x128xf32> to vector<2x32xf32>
    %182 = vector.extract_strided_slice %179 {offsets = [0, 64], sizes = [2, 32], strides = [1, 1]} : vector<2x128xf32> to vector<2x32xf32>
    %183 = vector.extract_strided_slice %179 {offsets = [0, 96], sizes = [2, 32], strides = [1, 1]} : vector<2x128xf32> to vector<2x32xf32>
    %184 = arith.mulf %181, %143 : vector<2x32xf32>
    %185 = arith.mulf %180, %183 : vector<2x32xf32>
    %186 = arith.addf %184, %185 : vector<2x32xf32>
    %187 = math.tanh %186 : vector<2x32xf32>
    %188 = arith.mulf %182, %187 : vector<2x32xf32>
    %cst_64 = arith.constant dense<0.000000e+00> : vector<2x128xf32>
    %189 = tpu.matmul %188, %2, %cst_64 {dimension_numbers = #tpu.dot_dimension_numbers<[1], [0], [0], [1], [0, 0, 1, 1], [], []>} : vector<2x32xf32>, vector<32x128xf32>, vector<2x128xf32> -> vector<2x128xf32>
    %c8 = arith.constant 8 : index
    %c0_65 = arith.constant 0 : index
    %190 = vector.load %arg8[%c8, %c0_65] : memref<16x128xf32, #tpu.memory_space<vmem>>, vector<2x128xf32>
    %191 = vector.shape_cast %188 : vector<2x32xf32> to vector<2x1x32xf32>
    %192 = vector.broadcast %191 : vector<2x1x32xf32> to vector<2x16x32xf32>
    %193 = arith.mulf %1, %192 : vector<2x16x32xf32>
    %cst_66 = arith.constant dense<0.000000e+00> : vector<2x16xf32>
    %194 = vector.multi_reduction <add>, %193, %cst_66 [2] : vector<2x16x32xf32> to vector<2x16xf32>
    %cst_67 = arith.constant 0.176776692 : f32
    %195 = vector.broadcast %cst_67 : f32 to vector<2x16xf32>
    %196 = arith.mulf %194, %195 : vector<2x16xf32>
    %197 = math.exp %196 : vector<2x16xf32>
    %cst_68 = arith.constant dense<0.000000e+00> : vector<2xf32>
    %198 = vector.multi_reduction <add>, %197, %cst_68 [1] : vector<2x16xf32> to vector<2xf32>
    %199 = vector.shape_cast %198 : vector<2xf32> to vector<2x1xf32>
    %200 = tpu.reciprocal %199 {approx = true} : vector<2x1xf32> -> vector<2x1xf32>
    %201 = vector.broadcast %200 : vector<2x1xf32> to vector<2x16xf32>
    %202 = arith.mulf %197, %201 : vector<2x16xf32>
    %203 = vector.shape_cast %202 : vector<2x16xf32> to vector<2x1x16xf32>
    %204 = vector.broadcast %203 : vector<2x1x16xf32> to vector<2x32x16xf32>
    %205 = arith.mulf %0, %204 : vector<2x32x16xf32>
    %cst_69 = arith.constant dense<0.000000e+00> : vector<2x32xf32>
    %206 = vector.multi_reduction <add>, %205, %cst_69 [2] : vector<2x32x16xf32> to vector<2x32xf32>
    %cst_70 = arith.constant dense<0.000000e+00> : vector<2x128xf32>
    %207 = tpu.matmul %206, %3, %cst_70 {dimension_numbers = #tpu.dot_dimension_numbers<[1], [0], [0], [1], [0, 0, 1, 1], [], []>} : vector<2x32xf32>, vector<32x128xf32>, vector<2x128xf32> -> vector<2x128xf32>
    %208 = arith.addf %190, %189 : vector<2x128xf32>
    %209 = arith.addf %208, %207 : vector<2x128xf32>
    %cst_71 = arith.constant 2.000000e+00 : f32
    %210 = vector.broadcast %cst_71 : f32 to vector<2x128xf32>
    %211 = arith.mulf %210, %209 : vector<2x128xf32>
    %212 = arith.select %16, %209, %211 : vector<2x128xi1>, vector<2x128xf32>
    %213 = arith.negf %212 : vector<2x128xf32>
    %214 = math.exp %213 : vector<2x128xf32>
    %cst_72 = arith.constant 1.000000e+00 : f32
    %215 = vector.broadcast %cst_72 : f32 to vector<2x128xf32>
    %216 = arith.addf %215, %214 : vector<2x128xf32>
    %217 = arith.divf %215, %216 : vector<2x128xf32>
    %cst_73 = arith.constant 2.000000e+00 : f32
    %218 = vector.broadcast %cst_73 : f32 to vector<2x128xf32>
    %219 = arith.mulf %218, %217 : vector<2x128xf32>
    %cst_74 = arith.constant 1.000000e+00 : f32
    %220 = vector.broadcast %cst_74 : f32 to vector<2x128xf32>
    %221 = arith.subf %219, %220 : vector<2x128xf32>
    %222 = arith.select %16, %217, %221 : vector<2x128xi1>, vector<2x128xf32>
    %223 = vector.extract_strided_slice %222 {offsets = [0, 0], sizes = [2, 32], strides = [1, 1]} : vector<2x128xf32> to vector<2x32xf32>
    %224 = vector.extract_strided_slice %222 {offsets = [0, 32], sizes = [2, 32], strides = [1, 1]} : vector<2x128xf32> to vector<2x32xf32>
    %225 = vector.extract_strided_slice %222 {offsets = [0, 64], sizes = [2, 32], strides = [1, 1]} : vector<2x128xf32> to vector<2x32xf32>
    %226 = vector.extract_strided_slice %222 {offsets = [0, 96], sizes = [2, 32], strides = [1, 1]} : vector<2x128xf32> to vector<2x32xf32>
    %227 = arith.mulf %224, %186 : vector<2x32xf32>
    %228 = arith.mulf %223, %226 : vector<2x32xf32>
    %229 = arith.addf %227, %228 : vector<2x32xf32>
    %230 = math.tanh %229 : vector<2x32xf32>
    %231 = arith.mulf %225, %230 : vector<2x32xf32>
    %cst_75 = arith.constant dense<0.000000e+00> : vector<2x128xf32>
    %232 = tpu.matmul %231, %2, %cst_75 {dimension_numbers = #tpu.dot_dimension_numbers<[1], [0], [0], [1], [0, 0, 1, 1], [], []>} : vector<2x32xf32>, vector<32x128xf32>, vector<2x128xf32> -> vector<2x128xf32>
    %c10 = arith.constant 10 : index
    %c0_76 = arith.constant 0 : index
    %233 = vector.load %arg8[%c10, %c0_76] : memref<16x128xf32, #tpu.memory_space<vmem>>, vector<2x128xf32>
    %234 = vector.shape_cast %231 : vector<2x32xf32> to vector<2x1x32xf32>
    %235 = vector.broadcast %234 : vector<2x1x32xf32> to vector<2x16x32xf32>
    %236 = arith.mulf %1, %235 : vector<2x16x32xf32>
    %cst_77 = arith.constant dense<0.000000e+00> : vector<2x16xf32>
    %237 = vector.multi_reduction <add>, %236, %cst_77 [2] : vector<2x16x32xf32> to vector<2x16xf32>
    %cst_78 = arith.constant 0.176776692 : f32
    %238 = vector.broadcast %cst_78 : f32 to vector<2x16xf32>
    %239 = arith.mulf %237, %238 : vector<2x16xf32>
    %240 = math.exp %239 : vector<2x16xf32>
    %cst_79 = arith.constant dense<0.000000e+00> : vector<2xf32>
    %241 = vector.multi_reduction <add>, %240, %cst_79 [1] : vector<2x16xf32> to vector<2xf32>
    %242 = vector.shape_cast %241 : vector<2xf32> to vector<2x1xf32>
    %243 = tpu.reciprocal %242 {approx = true} : vector<2x1xf32> -> vector<2x1xf32>
    %244 = vector.broadcast %243 : vector<2x1xf32> to vector<2x16xf32>
    %245 = arith.mulf %240, %244 : vector<2x16xf32>
    %246 = vector.shape_cast %245 : vector<2x16xf32> to vector<2x1x16xf32>
    %247 = vector.broadcast %246 : vector<2x1x16xf32> to vector<2x32x16xf32>
    %248 = arith.mulf %0, %247 : vector<2x32x16xf32>
    %cst_80 = arith.constant dense<0.000000e+00> : vector<2x32xf32>
    %249 = vector.multi_reduction <add>, %248, %cst_80 [2] : vector<2x32x16xf32> to vector<2x32xf32>
    %cst_81 = arith.constant dense<0.000000e+00> : vector<2x128xf32>
    %250 = tpu.matmul %249, %3, %cst_81 {dimension_numbers = #tpu.dot_dimension_numbers<[1], [0], [0], [1], [0, 0, 1, 1], [], []>} : vector<2x32xf32>, vector<32x128xf32>, vector<2x128xf32> -> vector<2x128xf32>
    %251 = arith.addf %233, %232 : vector<2x128xf32>
    %252 = arith.addf %251, %250 : vector<2x128xf32>
    %cst_82 = arith.constant 2.000000e+00 : f32
    %253 = vector.broadcast %cst_82 : f32 to vector<2x128xf32>
    %254 = arith.mulf %253, %252 : vector<2x128xf32>
    %255 = arith.select %16, %252, %254 : vector<2x128xi1>, vector<2x128xf32>
    %256 = arith.negf %255 : vector<2x128xf32>
    %257 = math.exp %256 : vector<2x128xf32>
    %cst_83 = arith.constant 1.000000e+00 : f32
    %258 = vector.broadcast %cst_83 : f32 to vector<2x128xf32>
    %259 = arith.addf %258, %257 : vector<2x128xf32>
    %260 = arith.divf %258, %259 : vector<2x128xf32>
    %cst_84 = arith.constant 2.000000e+00 : f32
    %261 = vector.broadcast %cst_84 : f32 to vector<2x128xf32>
    %262 = arith.mulf %261, %260 : vector<2x128xf32>
    %cst_85 = arith.constant 1.000000e+00 : f32
    %263 = vector.broadcast %cst_85 : f32 to vector<2x128xf32>
    %264 = arith.subf %262, %263 : vector<2x128xf32>
    %265 = arith.select %16, %260, %264 : vector<2x128xi1>, vector<2x128xf32>
    %266 = vector.extract_strided_slice %265 {offsets = [0, 0], sizes = [2, 32], strides = [1, 1]} : vector<2x128xf32> to vector<2x32xf32>
    %267 = vector.extract_strided_slice %265 {offsets = [0, 32], sizes = [2, 32], strides = [1, 1]} : vector<2x128xf32> to vector<2x32xf32>
    %268 = vector.extract_strided_slice %265 {offsets = [0, 64], sizes = [2, 32], strides = [1, 1]} : vector<2x128xf32> to vector<2x32xf32>
    %269 = vector.extract_strided_slice %265 {offsets = [0, 96], sizes = [2, 32], strides = [1, 1]} : vector<2x128xf32> to vector<2x32xf32>
    %270 = arith.mulf %267, %229 : vector<2x32xf32>
    %271 = arith.mulf %266, %269 : vector<2x32xf32>
    %272 = arith.addf %270, %271 : vector<2x32xf32>
    %273 = math.tanh %272 : vector<2x32xf32>
    %274 = arith.mulf %268, %273 : vector<2x32xf32>
    %cst_86 = arith.constant dense<0.000000e+00> : vector<2x128xf32>
    %275 = tpu.matmul %274, %2, %cst_86 {dimension_numbers = #tpu.dot_dimension_numbers<[1], [0], [0], [1], [0, 0, 1, 1], [], []>} : vector<2x32xf32>, vector<32x128xf32>, vector<2x128xf32> -> vector<2x128xf32>
    %c12 = arith.constant 12 : index
    %c0_87 = arith.constant 0 : index
    %276 = vector.load %arg8[%c12, %c0_87] : memref<16x128xf32, #tpu.memory_space<vmem>>, vector<2x128xf32>
    %277 = vector.shape_cast %274 : vector<2x32xf32> to vector<2x1x32xf32>
    %278 = vector.broadcast %277 : vector<2x1x32xf32> to vector<2x16x32xf32>
    %279 = arith.mulf %1, %278 : vector<2x16x32xf32>
    %cst_88 = arith.constant dense<0.000000e+00> : vector<2x16xf32>
    %280 = vector.multi_reduction <add>, %279, %cst_88 [2] : vector<2x16x32xf32> to vector<2x16xf32>
    %cst_89 = arith.constant 0.176776692 : f32
    %281 = vector.broadcast %cst_89 : f32 to vector<2x16xf32>
    %282 = arith.mulf %280, %281 : vector<2x16xf32>
    %283 = math.exp %282 : vector<2x16xf32>
    %cst_90 = arith.constant dense<0.000000e+00> : vector<2xf32>
    %284 = vector.multi_reduction <add>, %283, %cst_90 [1] : vector<2x16xf32> to vector<2xf32>
    %285 = vector.shape_cast %284 : vector<2xf32> to vector<2x1xf32>
    %286 = tpu.reciprocal %285 {approx = true} : vector<2x1xf32> -> vector<2x1xf32>
    %287 = vector.broadcast %286 : vector<2x1xf32> to vector<2x16xf32>
    %288 = arith.mulf %283, %287 : vector<2x16xf32>
    %289 = vector.shape_cast %288 : vector<2x16xf32> to vector<2x1x16xf32>
    %290 = vector.broadcast %289 : vector<2x1x16xf32> to vector<2x32x16xf32>
    %291 = arith.mulf %0, %290 : vector<2x32x16xf32>
    %cst_91 = arith.constant dense<0.000000e+00> : vector<2x32xf32>
    %292 = vector.multi_reduction <add>, %291, %cst_91 [2] : vector<2x32x16xf32> to vector<2x32xf32>
    %cst_92 = arith.constant dense<0.000000e+00> : vector<2x128xf32>
    %293 = tpu.matmul %292, %3, %cst_92 {dimension_numbers = #tpu.dot_dimension_numbers<[1], [0], [0], [1], [0, 0, 1, 1], [], []>} : vector<2x32xf32>, vector<32x128xf32>, vector<2x128xf32> -> vector<2x128xf32>
    %294 = arith.addf %276, %275 : vector<2x128xf32>
    %295 = arith.addf %294, %293 : vector<2x128xf32>
    %cst_93 = arith.constant 2.000000e+00 : f32
    %296 = vector.broadcast %cst_93 : f32 to vector<2x128xf32>
    %297 = arith.mulf %296, %295 : vector<2x128xf32>
    %298 = arith.select %16, %295, %297 : vector<2x128xi1>, vector<2x128xf32>
    %299 = arith.negf %298 : vector<2x128xf32>
    %300 = math.exp %299 : vector<2x128xf32>
    %cst_94 = arith.constant 1.000000e+00 : f32
    %301 = vector.broadcast %cst_94 : f32 to vector<2x128xf32>
    %302 = arith.addf %301, %300 : vector<2x128xf32>
    %303 = arith.divf %301, %302 : vector<2x128xf32>
    %cst_95 = arith.constant 2.000000e+00 : f32
    %304 = vector.broadcast %cst_95 : f32 to vector<2x128xf32>
    %305 = arith.mulf %304, %303 : vector<2x128xf32>
    %cst_96 = arith.constant 1.000000e+00 : f32
    %306 = vector.broadcast %cst_96 : f32 to vector<2x128xf32>
    %307 = arith.subf %305, %306 : vector<2x128xf32>
    %308 = arith.select %16, %303, %307 : vector<2x128xi1>, vector<2x128xf32>
    %309 = vector.extract_strided_slice %308 {offsets = [0, 0], sizes = [2, 32], strides = [1, 1]} : vector<2x128xf32> to vector<2x32xf32>
    %310 = vector.extract_strided_slice %308 {offsets = [0, 32], sizes = [2, 32], strides = [1, 1]} : vector<2x128xf32> to vector<2x32xf32>
    %311 = vector.extract_strided_slice %308 {offsets = [0, 64], sizes = [2, 32], strides = [1, 1]} : vector<2x128xf32> to vector<2x32xf32>
    %312 = vector.extract_strided_slice %308 {offsets = [0, 96], sizes = [2, 32], strides = [1, 1]} : vector<2x128xf32> to vector<2x32xf32>
    %313 = arith.mulf %310, %272 : vector<2x32xf32>
    %314 = arith.mulf %309, %312 : vector<2x32xf32>
    %315 = arith.addf %313, %314 : vector<2x32xf32>
    %316 = math.tanh %315 : vector<2x32xf32>
    %317 = arith.mulf %311, %316 : vector<2x32xf32>
    %cst_97 = arith.constant dense<0.000000e+00> : vector<2x128xf32>
    %318 = tpu.matmul %317, %2, %cst_97 {dimension_numbers = #tpu.dot_dimension_numbers<[1], [0], [0], [1], [0, 0, 1, 1], [], []>} : vector<2x32xf32>, vector<32x128xf32>, vector<2x128xf32> -> vector<2x128xf32>
    %c14 = arith.constant 14 : index
    %c0_98 = arith.constant 0 : index
    %319 = vector.load %arg8[%c14, %c0_98] : memref<16x128xf32, #tpu.memory_space<vmem>>, vector<2x128xf32>
    %320 = vector.shape_cast %317 : vector<2x32xf32> to vector<2x1x32xf32>
    %321 = vector.broadcast %320 : vector<2x1x32xf32> to vector<2x16x32xf32>
    %322 = arith.mulf %1, %321 : vector<2x16x32xf32>
    %cst_99 = arith.constant dense<0.000000e+00> : vector<2x16xf32>
    %323 = vector.multi_reduction <add>, %322, %cst_99 [2] : vector<2x16x32xf32> to vector<2x16xf32>
    %cst_100 = arith.constant 0.176776692 : f32
    %324 = vector.broadcast %cst_100 : f32 to vector<2x16xf32>
    %325 = arith.mulf %323, %324 : vector<2x16xf32>
    %326 = math.exp %325 : vector<2x16xf32>
    %cst_101 = arith.constant dense<0.000000e+00> : vector<2xf32>
    %327 = vector.multi_reduction <add>, %326, %cst_101 [1] : vector<2x16xf32> to vector<2xf32>
    %328 = vector.shape_cast %327 : vector<2xf32> to vector<2x1xf32>
    %329 = tpu.reciprocal %328 {approx = true} : vector<2x1xf32> -> vector<2x1xf32>
    %330 = vector.broadcast %329 : vector<2x1xf32> to vector<2x16xf32>
    %331 = arith.mulf %326, %330 : vector<2x16xf32>
    %332 = vector.shape_cast %331 : vector<2x16xf32> to vector<2x1x16xf32>
    %333 = vector.broadcast %332 : vector<2x1x16xf32> to vector<2x32x16xf32>
    %334 = arith.mulf %0, %333 : vector<2x32x16xf32>
    %cst_102 = arith.constant dense<0.000000e+00> : vector<2x32xf32>
    %335 = vector.multi_reduction <add>, %334, %cst_102 [2] : vector<2x32x16xf32> to vector<2x32xf32>
    %cst_103 = arith.constant dense<0.000000e+00> : vector<2x128xf32>
    %336 = tpu.matmul %335, %3, %cst_103 {dimension_numbers = #tpu.dot_dimension_numbers<[1], [0], [0], [1], [0, 0, 1, 1], [], []>} : vector<2x32xf32>, vector<32x128xf32>, vector<2x128xf32> -> vector<2x128xf32>
    %337 = arith.addf %319, %318 : vector<2x128xf32>
    %338 = arith.addf %337, %336 : vector<2x128xf32>
    %cst_104 = arith.constant 2.000000e+00 : f32
    %339 = vector.broadcast %cst_104 : f32 to vector<2x128xf32>
    %340 = arith.mulf %339, %338 : vector<2x128xf32>
    %341 = arith.select %16, %338, %340 : vector<2x128xi1>, vector<2x128xf32>
    %342 = arith.negf %341 : vector<2x128xf32>
    %343 = math.exp %342 : vector<2x128xf32>
    %cst_105 = arith.constant 1.000000e+00 : f32
    %344 = vector.broadcast %cst_105 : f32 to vector<2x128xf32>
    %345 = arith.addf %344, %343 : vector<2x128xf32>
    %346 = arith.divf %344, %345 : vector<2x128xf32>
    %cst_106 = arith.constant 2.000000e+00 : f32
    %347 = vector.broadcast %cst_106 : f32 to vector<2x128xf32>
    %348 = arith.mulf %347, %346 : vector<2x128xf32>
    %cst_107 = arith.constant 1.000000e+00 : f32
    %349 = vector.broadcast %cst_107 : f32 to vector<2x128xf32>
    %350 = arith.subf %348, %349 : vector<2x128xf32>
    %351 = arith.select %16, %346, %350 : vector<2x128xi1>, vector<2x128xf32>
    %352 = vector.extract_strided_slice %351 {offsets = [0, 0], sizes = [2, 32], strides = [1, 1]} : vector<2x128xf32> to vector<2x32xf32>
    %353 = vector.extract_strided_slice %351 {offsets = [0, 32], sizes = [2, 32], strides = [1, 1]} : vector<2x128xf32> to vector<2x32xf32>
    %354 = vector.extract_strided_slice %351 {offsets = [0, 64], sizes = [2, 32], strides = [1, 1]} : vector<2x128xf32> to vector<2x32xf32>
    %355 = vector.extract_strided_slice %351 {offsets = [0, 96], sizes = [2, 32], strides = [1, 1]} : vector<2x128xf32> to vector<2x32xf32>
    %356 = arith.mulf %353, %315 : vector<2x32xf32>
    %357 = arith.mulf %352, %355 : vector<2x32xf32>
    %358 = arith.addf %356, %357 : vector<2x32xf32>
    %359 = math.tanh %358 : vector<2x32xf32>
    %360 = arith.mulf %354, %359 : vector<2x32xf32>
    %361 = tpu.concatenate %59, %102, %145, %188, %231, %274, %317, %360 in 1 : vector<2x32xf32>, vector<2x32xf32>, vector<2x32xf32>, vector<2x32xf32>, vector<2x32xf32>, vector<2x32xf32>, vector<2x32xf32>, vector<2x32xf32> -> vector<2x256xf32>
    %c0_108 = arith.constant 0 : index
    %c0_109 = arith.constant 0 : index
    %362 = vector.load %arg7[%c0_108, %c0_109] : memref<2x256xf32, #tpu.memory_space<vmem>>, vector<2x256xf32>
    tpu.vector_store %arg7[%c0_108, %c0_109], %361 {strides = array<i32>} : memref<2x256xf32, #tpu.memory_space<vmem>>, vector<2x256xf32>,
    return
  }
}

</mosaic_0001>

<bundles_post_ra>
// kernel: tpu_custom_call.1
= control target key start
LH: loop header
LB: loop body
LE: loop exit
PB: predicated region body
PF: predicated region fallthrough
CT: control target
= control target key end

     0   :  { %12 = vsyncpa [#allocation4], 0  ;;  %s5513_s0 = inlined_call_operand.hbm [shape: f32[16,64], index: 0, kind: input, shape index: {}]   ;;  %s5514_s1 = inlined_call_operand.vmem [shape: f32[2,32,16], index: 1, kind: input, shape index: {}]   ;;  %s5515_s2 = inlined_call_operand.vmem [shape: f32[2,16,32], index: 2, kind: input, shape index: {}]   ;;  %s5516_s3 = inlined_call_operand.vmem [shape: f32[64,128], index: 3, kind: input, shape index: {}]   ;;  %s5517_s4 = inlined_call_operand.hbm [shape: f32[32,128], index: 4, kind: input, shape index: {}]   ;;  %s5518_s5 = inlined_call_operand.hbm [shape: f32[32,128], index: 5, kind: input, shape index: {}]   ;;  %s5519_s6 = inlined_call_operand.vmem [shape: f32[1,128], index: 6, kind: input, shape index: {}]   ;;  %s5520_s7 = inlined_call_operand.hbm [shape: f32[2,256], index: 7, kind: output, shape index: {}]  }
   0x1   :  { %13 = vsyncpa [#allocation7], 0 }
   0x2   :  { %14 = vsyncpa [#allocation5], 0  ;;  %s4374_s24 = smov [#allocation6]   ;;  %s4375_s26 = smov [#allocation3]  }
   0x3   :  { %s38_s25 = sshll.u32 %s4374_s24, 4  ;;  %s20_s27 = sshll.u32 %s4375_s26, 4  ;;  %s39_s25 = int_to_ptr.vmem [resolvable:$true] %s38_s25  ;;  %s4428_s27 = int_to_ptr.vmem [resolvable:$true] %s20_s27 }
   0x4   :  { %s4280_s30 = scalar_lea.hbm %s5517_s4, 512 }
   0x5   :  { %p4281_p0 = scmp.ne.s32.totalorder %s5517_s4, %s4280_s30  ;;  %p4284_p1 = scmp.lt.u32.totalorder %s4280_s30, %s5517_s4 }
   0x7   :  { %p4286_p2 = pnand %p4284_p1, %p4281_p0 }
   0x9   :  { %4289 = shalt.err (!%p4286_p2)
}
   0xa   :  { %s4290_s12 = scalar_lea.vmem %s39_s25, 512  ;;  %p4295_p4 = scmp.lt.s32.totalorder %s39_s25, %s39_s25 }
   0xb   :  { %p4291_p3 = scmp.ne.s32.totalorder %s39_s25, %s4290_s12  ;;  %p4296_p5 = scmp.lt.s32.totalorder %s4290_s12, %s4290_s12 }
   0xd   :  { %p4297_p6 = por %p4296_p5, %p4295_p4 }
   0xf   :  { %p4298_p7 = pnand %p4297_p6, %p4291_p3 }
  0x11   :  { %4301 = shalt.err (!%p4298_p7)
}
  0x12   :  { %s4376_s13 = smov 128   ;;  %s4377_s14 = smov 8  }
  0x13   :  { %44 = dma.hbm_to_vmem [thread:$0]  %s5517_s4, 512, %s39_s25, [#allocation7], %s4376_s13, %s4376_s13, %s4377_s14  }
  0x14   :  { %s4302_s19 = scalar_lea.hbm %s5513_s0, 256 }
  0x15   :  { %p4303_p8 = scmp.ne.s32.totalorder %s5513_s0, %s4302_s19  ;;  %p4306_p9 = scmp.lt.u32.totalorder %s4302_s19, %s5513_s0 }
  0x17   :  { %p4308_p10 = pnand %p4306_p9, %p4303_p8 }
  0x19   :  { %4311 = shalt.err (!%p4308_p10)
}
  0x1a   :  { %s4312_s24 = scalar_lea.vmem %s4428_s27, 256  ;;  %p4317_p12 = scmp.lt.s32.totalorder %s4428_s27, %s4428_s27 }
  0x1b   :  { %p4313_p11 = scmp.ne.s32.totalorder %s4428_s27, %s4312_s24  ;;  %p4318_p13 = scmp.lt.s32.totalorder %s4312_s24, %s4312_s24 }
  0x1d   :  { %p4319_p0 = por %p4318_p13, %p4317_p12 }
  0x1f   :  { %p4320_p1 = pnand %p4319_p0, %p4313_p11 }
  0x21   :  { %4323 = shalt.err (!%p4320_p1)
}
  0x22   :  { %26 = dma.hbm_to_vmem [thread:$0]  %s5513_s0, 256, %s4428_s27, [#allocation4], %s4376_s13, %s4376_s13, %s4377_s14  }
  0x23   :  { %s4378_s26 = smov [#allocation8]   ;;  %s4324_s8 = scalar_lea.hbm %s5518_s5, 512 }
  0x24   :  { %s50_s28 = sshll.u32 %s4378_s26, 4  ;;  %p4325_p2 = scmp.ne.s32.totalorder %s5518_s5, %s4324_s8  ;;  %s51_s28 = int_to_ptr.vmem [resolvable:$true] %s50_s28 }
  0x25   :  { %p4328_p3 = scmp.lt.u32.totalorder %s4324_s8, %s5518_s5 }
  0x27   :  { %p4330_p4 = pnand %p4328_p3, %p4325_p2 }
  0x29   :  { %4333 = shalt.err (!%p4330_p4)
}
  0x2a   :  { %s4334_s15 = scalar_lea.vmem %s51_s28, 512  ;;  %p4339_p6 = scmp.lt.s32.totalorder %s51_s28, %s51_s28 }
  0x2b   :  { %p4335_p5 = scmp.ne.s32.totalorder %s51_s28, %s4334_s15  ;;  %p4340_p7 = scmp.lt.s32.totalorder %s4334_s15, %s4334_s15 }
  0x2d   :  { %p4341_p8 = por %p4340_p7, %p4339_p6 }
  0x2f   :  { %p4342_p9 = pnand %p4341_p8, %p4335_p5 }
  0x31   :  { %4345 = shalt.err (!%p4342_p9)
}
  0x32   :  { %56 = dma.hbm_to_vmem [thread:$0]  %s5518_s5, 512, %s51_s28, [#allocation7], %s4376_s13, %s4376_s13, %s4377_s14  }
  0x33   :  { %4368 = dma.done.wait [#allocation4], 256  }
  0x34   :  { %4369 = vsyncadd [#allocation4], 4294967040 }
  0x35   :  { %4370 = dma.done.wait [#allocation7], 1024  }
  0x36   :  { %4371 = vsyncadd [#allocation7], 4294966272  ;;  %vm189_vm0 = vcmask 130048   ;;  %v4483_v0 = vld [vmem:[%s5514_s1 + $0x20] sm:$0xff]  ;;  %v4493_v2 = vld [vmem:[%s5514_s1 + $0x28] sm:$0xff]  ;;  %v4379_v19 = vmov 0.0|0.0   ;;  %v223_v24 = vlaneseq }
  0x37   :  { %v4488_v1 = vld [vmem:[%s5514_s1] sm:$0xff]  ;;  %v202_v3 = vsel %vm189_vm0, %v4483_v0, 0.0  ;;  %v4502_v5 = vld [vmem:[%s5514_s1 + $0x8] sm:$0xff]  ;;  %v205_v6 = vsel %vm189_vm0, %v4493_v2, 0.0  ;;  %v4511_v8 = vld [vmem:[%s5514_s1 + $0x30] sm:$0xff]  ;;  %3993 = vmatprep.subr.bf16.mxu1 %v4379_v19  ;;  %vm4380_vm1 = vmmov 0  }
  0x38   :  { %v190_v4 = vsel %vm189_vm0, %v4488_v1, 0.0  ;;  %203 = vadd.xlane.f32.xlu1 %v202_v3  ;;  %v193_v7 = vsel %vm189_vm0, %v4502_v5, 0.0  ;;  %v4516_v9 = vld [vmem:[%s5514_s1 + $0x10] sm:$0xff]  ;;  %v208_v10 = vsel %vm189_vm0, %v4511_v8, 0.0  ;;  %v4525_v12 = vld [vmem:[%s5514_s1 + $0x38] sm:$0xff]  ;;  %v80_v16 = vld [vmem:[#allocation6] sm:$0xff] }
  0x39   :  { %191 = vadd.xlane.f32.xlu0 %v190_v4  ;;  %v196_v11 = vsel %vm189_vm0, %v4516_v9, 0.0  ;;  %v4530_v13 = vld [vmem:[%s5514_s1 + $0x18] sm:$0xff]  ;;  %v211_v14 = vsel %vm189_vm0, %v4525_v12, 0.0  ;;  %v81_v17 = vld [vmem:[#allocation6 + $0x8] sm:$0xff]  ;;  %v82_v20 = vld [vmem:[#allocation6 + $0x10] sm:$0xff]  ;;  %v4381_v23 = vmov 0.0  }
  0x3a   :  { %v199_v15 = vsel %vm189_vm0, %v4530_v13, 0.0  ;;  %v4536_v18 = vpack.c.bf16 %v81_v17, %v80_v16  ;;  %v83_v21 = vld [vmem:[#allocation6 + $0x18] sm:$0xff]  ;;  %3809 = vmatprep.mubr.msk.f32.mxu1 %vm4380_vm1, %v4381_v23  ;;  %v4547_v25 = vand.u32 127, %v223_v24  ;;  %v4549_v26 = vshrl.u32 %v223_v24, 7  ;;  %s4385_s28 = smov 64  }
  0x3b   :  { %v4541_v22 = vpack.c.bf16 %v83_v21, %v82_v20  ;;  %vm668_vm2 = vcmask 392512   ;;  %vm243_vm3 = vcmask 130112   ;;  %vm675_vm4 = vcmask 458112  }
  0x3c   :  { %206 = vadd.xlane.f32.xlu1 %v205_v6  ;;  %3995 = vmatpush3.bf16.msra.mxu1 %v4536_v18  ;;  %v658_v27 = vadd.s32 4294967264, %v4547_v25  ;;  %v663_v28 = vadd.s32 4294967256, %v4547_v25  ;;  %v238_v32 = vadd.s32 4294967288, %v4547_v25  ;;  %v245_v36 = vadd.s32 4294967280, %v4547_v25 }
  0x3d   :  { %194 = vadd.xlane.f32.xlu0 %v193_v7  ;;  %3996 = vmatprep.subr.bf16.mxu1 %v4379_v19  ;;  %v252_v37 = vadd.s32 4294967272, %v4547_v25  ;;  %v670_v40 = vadd.s32 4294967248, %v4547_v25  ;;  %v4561_v44 = vsub.s32 %v4547_v25, %v4549_v26  ;;  %v677_v49 = vadd.s32 4294967240, %v4547_v25 }
  0x3e   :  { %v661_v33 = vsub.s32 %v658_v27, %v4549_v26  ;;  %v666_v35 = vsub.s32 %v663_v28, %v4549_v26  ;;  %v4564_v45 = vsub.s32 %v238_v32, %v4549_v26  ;;  %v4568_v50 = vsub.s32 %v245_v36, %v4549_v26  ;;  %v4604_v36 = vld [vmem:[%s5515_s2 + $0x18] sm:$0xff] }
  0x3f   :  { %v4571_v51 = vsub.s32 %v252_v37, %v4549_v26  ;;  %v673_v52 = vsub.s32 %v670_v40, %v4549_v26  ;;  %v680_v63 = vsub.s32 %v677_v49, %v4549_v26  ;;  %vm250_vm5 = vcmask 195712   ;;  %v4609_v37 = vld [vmem:[%s5515_s2 + $0x10] sm:$0xff] }
  0x40   :  { %209 = vadd.xlane.f32.xlu1 %v208_v10  ;;  %3998 = vmatpush3.bf16.msra.mxu1 %v4541_v22  ;;  %vm257_vm6 = vcmask 261312   ;;  %vm278_vm7 = vcmask 1041409   ;;  %vm682_vm8 = vcmask 523712   ;;  %vm280_vm9 = vcmask 261120  }
  0x41   :  { %197 = vadd.xlane.f32.xlu0 %v196_v11  ;;  %3999 = vmatprep.subr.bf16.mxu1 %v4379_v19  ;;  %vm426_vm10 = vcmask 123904   ;;  %vm105_vm11 = vcmask 523264   ;;  %vm225_vm12 = vcmp.lt.s32.totalorder %v4547_v25, 96  ;;  %vm3623_vm13 = vcmask 785408  }
  0x44   :  { %212 = vadd.xlane.f32.xlu1 %v211_v14 }
  0x45   :  { %200 = vadd.xlane.f32.xlu0 %v199_v15 }
  0xc5   :  { %v204_v29 = vpop.xlane.xlu1 %203 }
  0xc6   :  { %v192_v30 = vpop.xlane.xlu0 %191  ;;  %v219_v31 = vmul.f32 0.0625, %v204_v29 }
  0xc7   :  { %v215_v34 = vmul.f32 0.0625, %v192_v30  ;;  %v4590_v30 = vld [vmem:[%s5515_s2 + $0x8] sm:$0xff] }
  0xc8   :  { %v687_v41 = vrot.slane %v219_v31, %v661_v33  ;;  %v262_v55 = vrot.slane %v219_v31, %v4561_v44  ;;  %v4595_v31 = vld [vmem:[%s5515_s2] sm:$0xff] }
  0xc9   :  { %v207_v38 = vpop.xlane.xlu1 %206  ;;  %v662_v46 = vrot.slane %v215_v34, %v661_v33  ;;  %v237_v62 = vrot.slane %v215_v34, %v4561_v44 }
  0xca   :  { %v195_v39 = vpop.xlane.xlu0 %194  ;;  %v220_v42 = vmul.f32 0.0625, %v207_v38 }
  0xcb   :  { %v216_v43 = vmul.f32 0.0625, %v195_v39 }
  0xcc   :  { %v691_v47 = vrot.slane %v220_v42, %v666_v35  ;;  %v266_v58 = vrot.slane %v220_v42, %v4564_v45 }
  0xcd   :  { %v667_v48 = vrot.slane %v216_v43, %v666_v35  ;;  %v210_v53 = vpop.xlane.xlu1 %209  ;;  %v242_v59 = vrot.slane %v216_v43, %v4564_v45 }
  0xce   :  { %v198_v54 = vpop.xlane.xlu0 %197  ;;  %v692_v56 = vsel %vm668_vm2, %v691_v47, %v687_v41  ;;  %v221_v60 = vmul.f32 0.0625, %v210_v53  ;;  %v267_v16 = vsel %vm243_vm3, %v266_v58, %v262_v55 }
  0xcf   :  { %v669_v57 = vsel %vm668_vm2, %v667_v48, %v662_v46  ;;  %v217_v61 = vmul.f32 0.0625, %v198_v54  ;;  %v244_v17 = vsel %vm243_vm3, %v242_v59, %v237_v62 }
  0xd0   :  { %v271_v3 = vrot.slane %v221_v60, %v4568_v50  ;;  %v696_v4 = vrot.slane %v221_v60, %v673_v52 }
  0xd1   :  { %v249_v6 = vrot.slane %v217_v61, %v4568_v50  ;;  %v674_v7 = vrot.slane %v217_v61, %v673_v52  ;;  %v213_v10 = vpop.xlane.xlu1 %212 }
  0xd2   :  { %v201_v11 = vpop.xlane.xlu0 %200  ;;  %v222_v14 = vmul.f32 0.0625, %v213_v10  ;;  %v697_v20 = vsel %vm675_vm4, %v696_v4, %v692_v56  ;;  %v272_v33 = vsel %vm250_vm5, %v271_v3, %v267_v16 }
  0xd3   :  { %v218_v15 = vmul.f32 0.0625, %v201_v11  ;;  %v676_v21 = vsel %vm675_vm4, %v674_v7, %v669_v57  ;;  %v251_v32 = vsel %vm250_vm5, %v249_v6, %v244_v17 }
  0xd4   :  { %v276_v24 = vrot.slane %v222_v14, %v4571_v51  ;;  %v701_v27 = vrot.slane %v222_v14, %v680_v63 }
  0xd5   :  { %v256_v28 = vrot.slane %v218_v15, %v4571_v51  ;;  %v681_v29 = vrot.slane %v218_v15, %v680_v63 }
  0xd6   :  { %v277_v35 = vsel %vm257_vm6, %v276_v24, %v272_v33  ;;  %v702_v39 = vsel %vm682_vm8, %v701_v27, %v697_v20  ;;  %v4640_v33 = vsub.s32 1, %v4549_v26 }
  0xd7   :  { %v258_v34 = vsel %vm257_vm6, %v256_v28, %v251_v32  ;;  %v683_v38 = vsel %vm682_vm8, %v681_v29, %v676_v21  ;;  %v377_v48 = vmul.f32 %v277_v35, %v4604_v36  ;;  %v376_v49 = vmul.f32 %v277_v35, %v4609_v37 }
  0xd8   :  { %v279_v40 = vsel %vm278_vm7, %v277_v35, %v258_v34  ;;  %v375_v41 = vmul.f32 %v258_v34, %v4590_v30  ;;  %v374_v42 = vmul.f32 %v258_v34, %v4595_v31  ;;  %v4618_v43 = vsel %vm278_vm7, %v702_v39, %v683_v38 }
  0xd9   :  { %3810 = vmatmul.mubr.msk.f32.vlgmr.msra.gmra.mrb[0].mxu1 %vm280_vm9, %v279_v40  ;;  %v387_v52 = vsel %vm280_vm9, %v377_v48, 0.0  ;;  %v384_v53 = vsel %vm280_vm9, %v376_v49, 0.0  ;;  %v4382_v28 = vmov 0   ;;  %v4637_v32 = vsub.s32 0, %v4549_v26 }
  0xda   :  { %v381_v46 = vsel %vm280_vm9, %v375_v41, 0.0  ;;  %v378_v47 = vsel %vm280_vm9, %v374_v42, 0.0  ;;  %3820 = vmatprep.mubr.msk.f32.mxu1 %vm4380_vm1, %v4381_v23  ;;  %4127 = vset.pattern.permute.xlu0 %v4382_v28 }
  0xdb   :  { %382 = vadd.xlane.f32.xlu1 %v381_v46  ;;  %379 = vadd.xlane.f32.xlu0 %v378_v47 }
  0xdc   :  { %4126 = vset.pattern.permute.xlu1 %v4382_v28 }
  0xdf   :  { %388 = vadd.xlane.f32.xlu1 %v387_v52  ;;  %385 = vadd.xlane.f32.xlu0 %v384_v53 }
 0x168   :  { %v383_v54 = vpop.xlane.xlu1 %382  ;;  %v380_v55 = vpop.xlane.xlu0 %379 }
 0x169   :  { %v391_v56 = vmul.f32 0.17677669, %v383_v54  ;;  %v390_v57 = vmul.f32 0.17677669, %v380_v55 }
 0x16b   :  { %v396_v58 = vmul.f32 1.442695, %v391_v56  ;;  %v394_v59 = vmul.f32 1.442695, %v390_v57 }
 0x16c   :  { %v389_v60 = vpop.xlane.xlu1 %388  ;;  %v386_v61 = vpop.xlane.xlu0 %385 }
 0x16d   :  { %4128 = vpow2.f32 %v396_v58  ;;  %v393_v62 = vmul.f32 0.17677669, %v389_v60  ;;  %v392_v63 = vmul.f32 0.17677669, %v386_v61 }
 0x16e   :  { %4130 = vpow2.f32 %v394_v59 }
 0x16f   :  { %v400_v3 = vmul.f32 1.442695, %v393_v62  ;;  %v398_v4 = vmul.f32 1.442695, %v392_v63 }
 0x171   :  { %4132 = vpow2.f32 %v400_v3 }
 0x172   :  { %4134 = vpow2.f32 %v398_v4 }
 0x177   :  { %v4129_v6 = vpop.eup %4128 }
 0x178   :  { %v4131_v7 = vpop.eup %4130  ;;  %v413_v14 = vrot.slane %v4129_v6, %v4564_v45 }
 0x179   :  { %v409_v11 = vrot.slane %v4131_v7, %v4561_v44 }
 0x17b   :  { %v4133_v10 = vpop.eup %4132  ;;  %v414_v20 = vsel %vm243_vm3, %v413_v14, %v409_v11  ;;  %v90_v11 = vld [vmem:[%s5516_s3] sm:$0xff]  ;;  %v91_v14 = vld [vmem:[%s5516_s3 + $0x8] sm:$0xff] }
 0x17c   :  { %v4135_v15 = vpop.eup %4134  ;;  %v422_v16 = vrot.slane %v4133_v10, %v4564_v45 }
 0x17d   :  { %v418_v17 = vrot.slane %v4135_v15, %v4561_v44 }
 0x17f   :  { %v423_v21 = vsel %vm243_vm3, %v422_v16, %v418_v17 }
 0x180   :  { %v424_v24 = vsel %vm278_vm7, %v423_v21, %v414_v20  ;;  %v92_v20 = vld [vmem:[%s5516_s3 + $0x10] sm:$0xff]  ;;  %v93_v21 = vld [vmem:[%s5516_s3 + $0x18] sm:$0xff] }
 0x181   :  { %v427_v27 = vsel %vm426_vm10, %v424_v24, 0.0  ;;  %v3981_v24 = vpack.c.bf16 %v93_v21, %v92_v20 }
 0x182   :  { %428 = vadd.xlane.f32.xlu0 %v427_v27 }
 0x20f   :  { %v429_v29 = vpop.xlane.xlu0 %428 }
 0x210   :  { %4136 = vrcp.f32 %v429_v29  ;;  %v94_v29 = vld [vmem:[%s5516_s3 + $0x20] sm:$0xff] }
 0x21a   :  { %v4137_v34 = vpop.eup %4136 }
 0x21b   :  { %v435_v35 = vrot.slane %v4137_v34, %v4637_v32  ;;  %v439_v40 = vrot.slane %v4137_v34, %v4640_v33  ;;  %v95_v34 = vld [vmem:[%s5516_s3 + $0x28] sm:$0xff] }
 0x21d   :  { %v443_v38 = vmul.f32 %v4129_v6, %v435_v35  ;;  %v442_v39 = vmul.f32 %v4131_v7, %v435_v35  ;;  %v444_v41 = vmul.f32 %v4135_v15, %v439_v40  ;;  %v445_v42 = vmul.f32 %v4133_v10, %v439_v40  ;;  %v97_v40 = vld [vmem:[%s5516_s3 + $0x38] sm:$0xff] }
 0x21e   :  { %v3977_v15 = vpack.c.bf16 %v91_v14, %v90_v11  ;;  %v3985_v35 = vpack.c.bf16 %v95_v34, %v94_v29 }
 0x21f   :  { %454 = vperm.xlu0 %4127, %v443_v38   ;;  %451 = vperm.xlu1 %4126, %v442_v39   ;;  %v96_v39 = vld [vmem:[%s5516_s3 + $0x30] sm:$0xff] }
 0x220   :  { %3978 = vmatprep.subr.bf16.mxu0 %v3977_v15 }
 0x221   :  { %3980 = vmatpush3.bf16.msra.mxu0 %v3977_v15 }
 0x222   :  { %3982 = vmatprep.subr.bf16.mxu0 %v3981_v24 }
 0x223   :  { %457 = vperm.xlu1 %4126, %v444_v41   ;;  %v3989_v41 = vpack.c.bf16 %v97_v40, %v96_v39 }
 0x225   :  { %3984 = vmatpush3.bf16.msra.mxu0 %v3981_v24 }
 0x226   :  { %3986 = vmatprep.subr.bf16.mxu0 %v3985_v35 }
 0x227   :  { %460 = vperm.xlu1 %4126, %v445_v42   ;;  %v88_v42 = vld [vmem:[#allocation3] sm:$0xff] }
 0x228   :  { %3798 = vmatprep.mubr.msk.f32.mxu0 %vm105_vm11, %v88_v42 }
 0x229   :  { %3988 = vmatpush3.bf16.msra.mxu0 %v3985_v35 }
 0x22a   :  { %3990 = vmatprep.subr.bf16.mxu0 %v3989_v41 }
 0x22d   :  { %3992 = vmatpush3.bf16.msra.mxu0 %v3989_v41 }
 0x22e   :  { %4011 = vmatprep.subr.bf16.mxu0 %v4379_v19 }
 0x29e   :  { %v455_v46 = vpop.permute.xlu0 %454  ;;  %v452_v47 = vpop.permute.xlu1 %451 }
 0x29f   :  { %v469_v48 = vrot.slane %v455_v46, %v4564_v45  ;;  %v465_v49 = vrot.slane %v452_v47, %v4561_v44  ;;  %v89_v46 = vld [vmem:[#allocation3 + $0x8] sm:$0xff]  ;;  %v84_v47 = vld [vmem:[#allocation8] sm:$0xff] }
 0x2a0   :  { %3799 = vmatmul.mubr.msk.f32.vlgmr.msra.gmra.mrb[0].mxu0 %vm105_vm11, %v89_v46 }
 0x2a1   :  { %v470_v52 = vsel %vm243_vm3, %v469_v48, %v465_v49  ;;  %3842 = vmatprep.mubr.msk.f32.mxu0 %vm4380_vm1, %v4381_v23  ;;  %v85_v48 = vld [vmem:[#allocation8 + $0x8] sm:$0xff] }
 0x2a2   :  { %v458_v53 = vpop.permute.xlu1 %457  ;;  %v495_v54 = vmul.f32 %v470_v52, %v4502_v5  ;;  %v494_v55 = vmul.f32 %v470_v52, %v4488_v1  ;;  %v496_v10 = vmul.f32 %v470_v52, %v4516_v9  ;;  %v497_v28 = vmul.f32 %v470_v52, %v4530_v13  ;;  %v86_v52 = vld [vmem:[#allocation8 + $0x10] sm:$0xff] }
 0x2a3   :  { %v474_v59 = vrot.slane %v458_v53, %v4561_v44  ;;  %v4695_v49 = vpack.c.bf16 %v85_v48, %v84_v47  ;;  %v87_v53 = vld [vmem:[#allocation8 + $0x18] sm:$0xff] }
 0x2a4   :  { %v505_v56 = vsel %vm189_vm0, %v495_v54, 0.0  ;;  %v502_v57 = vsel %vm189_vm0, %v494_v55, 0.0  ;;  %v508_v16 = vsel %vm189_vm0, %v496_v10, 0.0  ;;  %v511_v38 = vsel %vm189_vm0, %v497_v28, 0.0  ;;  %v3656_v28 = vld [vmem:[%s5519_s6] ss:$0 sm:$0xff] }
 0x2a5   :  { %506 = vadd.xlane.f32.xlu0 %v505_v56  ;;  %503 = vadd.xlane.f32.xlu1 %v502_v57  ;;  %v4701_v54 = vpack.c.bf16 %v87_v53, %v86_v52  ;;  %s4383_s6 = smov 32  }
 0x2a6   :  { %v461_v58 = vpop.permute.xlu1 %460  ;;  %4001 = vmatpush3.bf16.msra.mxu1 %v4695_v49  ;;  %4013 = vmatpush3.bf16.msra.mxu0 %v4695_v49 }
 0x2a7   :  { %v478_v60 = vrot.slane %v461_v58, %v4564_v45  ;;  %4002 = vmatprep.subr.bf16.mxu1 %v4379_v19  ;;  %4014 = vmatprep.subr.bf16.mxu0 %v4379_v19 }
 0x2a9   :  { %v479_v61 = vsel %vm243_vm3, %v478_v60, %v474_v59 }
 0x2aa   :  { %v501_v62 = vmul.f32 %v479_v61, %v4525_v12  ;;  %v498_v63 = vmul.f32 %v479_v61, %v4483_v0  ;;  %v499_v6 = vmul.f32 %v479_v61, %v4493_v2  ;;  %v500_v17 = vmul.f32 %v479_v61, %v4511_v8  ;;  %4004 = vmatpush3.bf16.msra.mxu1 %v4701_v54 }
 0x2ab   :  { %4016 = vmatpush3.bf16.msra.mxu0 %v4701_v54  ;;  %4005 = vmatprep.subr.bf16.mxu1 %v4379_v19 }
 0x2ac   :  { %v523_v3 = vsel %vm189_vm0, %v501_v62, 0.0  ;;  %v514_v4 = vsel %vm189_vm0, %v498_v63, 0.0  ;;  %v517_v7 = vsel %vm189_vm0, %v499_v6, 0.0  ;;  %v520_v27 = vsel %vm189_vm0, %v500_v17, 0.0  ;;  %4029 = vmatprep.subr.bf16.mxu0 %v4379_v19 }
 0x2ad   :  { %524 = vadd.xlane.f32.xlu0 %v523_v3  ;;  %515 = vadd.xlane.f32.xlu1 %v514_v4 }
 0x2b1   :  { %518 = vadd.xlane.f32.xlu1 %v517_v7 }
 0x2b5   :  { %509 = vadd.xlane.f32.xlu1 %v508_v16 }
 0x2b9   :  { %521 = vadd.xlane.f32.xlu1 %v520_v27 }
 0x2bd   :  { %512 = vadd.xlane.f32.xlu1 %v511_v38 }
 0x332   :  { %v504_v55 = vpop.xlane.xlu1 %503  ;;  %v507_v59 = vpop.xlane.xlu0 %506 }
 0x333   :  { %v541_v62 = vrot.slane %v507_v59, %v4564_v45  ;;  %v537_v63 = vrot.slane %v504_v55, %v4561_v44 }
 0x335   :  { %v542_v15 = vsel %vm243_vm3, %v541_v62, %v537_v63 }
 0x33a   :  { %v516_v56 = vpop.xlane.xlu1 %515  ;;  %v525_v6 = vpop.xlane.xlu0 %524 }
 0x33b   :  { %v556_v3 = vrot.slane %v516_v56, %v4561_v44  ;;  %v570_v16 = vrot.slane %v525_v6, %v4571_v51 }
 0x33e   :  { %v519_v57 = vpop.xlane.xlu1 %518 }
 0x33f   :  { %v560_v60 = vrot.slane %v519_v57, %v4564_v45 }
 0x341   :  { %v561_v10 = vsel %vm243_vm3, %v560_v60, %v556_v3 }
 0x342   :  { %v510_v58 = vpop.xlane.xlu1 %509 }
 0x343   :  { %v546_v7 = vrot.slane %v510_v58, %v4568_v50 }
 0x345   :  { %v547_v20 = vsel %vm250_vm5, %v546_v7, %v542_v15 }
 0x346   :  { %v522_v61 = vpop.xlane.xlu1 %521 }
 0x347   :  { %v565_v4 = vrot.slane %v522_v61, %v4568_v50 }
 0x349   :  { %v566_v11 = vsel %vm250_vm5, %v565_v4, %v561_v10  ;;  %v4384_v4 = vmov 1966171168  }
 0x34a   :  { %v513_v14 = vpop.xlane.xlu1 %512  ;;  %v571_v24 = vsel %vm257_vm6, %v570_v16, %v566_v11  ;;  %v799_v6 = vunpack.c.l.s4 %v4384_v4 }
 0x34b   :  { %v551_v17 = vrot.slane %v513_v14, %v4571_v51 }
 0x34c   :  { %v800_v7 = vunpack.c.0.s8 %v799_v6 }
 0x34d   :  { %v552_v21 = vsel %vm257_vm6, %v551_v17, %v547_v20 }
 0x34e   :  { %v572_v27 = vsel %vm278_vm7, %v571_v24, %v552_v21  ;;  %v4745_v10 = vsub.s32 %v800_v7, %v4549_v26 }
 0x34f   :  { %3821 = vmatmul.mubr.msk.f32.vlgmr.msra.gmra.mrb[0].mxu1 %vm280_vm9, %v572_v27 }
 0x350   :  { %4007 = vmatpush3.bf16.msra.mxu1 %v4536_v18  ;;  %3831 = vmatprep.mubr.msk.f32.mxu1 %vm4380_vm1, %v4381_v23 }
 0x351   :  { %4008 = vmatprep.subr.bf16.mxu1 %v4379_v19 }
 0x354   :  { %4010 = vmatpush3.bf16.msra.mxu1 %v4541_v22 }
 0x355   :  { %4017 = vmatprep.subr.bf16.mxu1 %v4379_v19 }
 0x373   :  { %v3800_v29 = vpop.f32.mrb[0].mxu0 }
 0x374   :  { %v184_v34 = vadd.f32 %v3800_v29, %v3656_v28  ;;  %v178_v35 = vpop.f32.mrb[1].mxu0 }
 0x375   :  { %v179_v38 = vadd.f32 %v3656_v28, %v178_v35 }
 0x376   :  { %188 = vst [vmem:[#allocation2 + $0x8] sm:$0xff] %v184_v34 }
 0x377   :  { %187 = vst [vmem:[#allocation2] sm:$0xff] %v179_v38 }
 0x37e   :  { %v353_v39 = vld [vmem:[#allocation2] sm:$0x3] }
 0x422   :  { %v641_v40 = vpop.f32.mrb[0].mxu1 }
 0x423   :  { %v4089_v41 = vadd.f32 %v641_v40, %v353_v39  ;;  %v3822_v42 = vpop.f32.mrb[1].mxu1 }
 0x425   :  { %v647_v46 = vmul.f32 2.0, %v4089_v41 }
 0x427   :  { %v648_v47 = vsel %vm225_vm12, %v4089_v41, %v647_v46 }
 0x428   :  { %v3661_v48 = vmul.f32 -1.442695, %v648_v47 }
 0x42a   :  { %4138 = vpow2.f32 %v3661_v48 }
 0x434   :  { %v4139_v52 = vpop.eup %4138 }
 0x435   :  { %v652_v53 = vadd.f32 1.0, %v4139_v52 }
 0x437   :  { %4140 = vrcp.f32 %v652_v53 }
 0x441   :  { %v4141_v55 = vpop.eup %4140 }
 0x442   :  { %v655_v56 = vmul.f32 2.0, %v4141_v55 }
 0x444   :  { %v3662_v57 = vadd.f32 -1.0, %v655_v56 }
 0x446   :  { %v657_v58 = vsel %vm225_vm12, %v4141_v55, %v3662_v57 }
 0x447   :  { %707 = vrot.lane.b32.xlu1 %v657_v58, %s4383_s6  ;;  %v705_v61 = vmul.f32 %v4618_v43, %v657_v58 }
 0x4b9   :  { %v708_v59 = vpop.permute.xlu1 %707 }
 0x4ba   :  { %v710_v60 = vmul.f32 %v708_v59, %v657_v58 }
 0x4bc   :  { %712 = vrot.lane.b32.xlu0 %v710_v60, %s4383_s6 }
 0x52e   :  { %v713_v62 = vpop.permute.xlu0 %712 }
 0x52f   :  { %v4740_v63 = vadd.f32 %v713_v62, %v705_v61 }
 0x531   :  { %4142 = vtanh.f32 %v4740_v63 }
 0x53b   :  { %v4143_v3 = vpop.eup %4142 }
 0x53c   :  { %718 = vrot.lane.b32.xlu1 %v4143_v3, %s4383_s6 }
 0x5ae   :  { %v719_v11 = vpop.permute.xlu1 %718 }
 0x5af   :  { %v4747_v14 = vmul.f32 %v719_v11, %v657_v58 }
 0x5b1   :  { %v804_v43 = vrot.slane %v4747_v14, %v4745_v10 }
 0x5b3   :  { %v805_v15 = vcombine.high %v804_v43, %v804_v43  ;;  %v812_v16 = vrot.slane %v804_v43, %v4745_v10 }
 0x5b5   :  { %v823_v17 = vrot.slane %v812_v16, %v4637_v32  ;;  %v819_v20 = vrot.slane %v805_v15, %v4745_v10 }
 0x5b7   :  { %828 = vrot.lane.b32.xlu1 %v823_v17, %s4385_s28  ;;  %v827_v21 = vrot.slane %v819_v20, %v4637_v32 }
 0x5b9   :  { %830 = vrot.lane.b32.xlu0 %v827_v21, %s4385_s28 }
 0x629   :  { %v829_v26 = vpop.permute.xlu1 %828 }
 0x62a   :  { %v834_v24 = vmul.f32 %v829_v26, %v4595_v31  ;;  %v835_v27 = vmul.f32 %v829_v26, %v4590_v30 }
 0x62b   :  { %v831_v28 = vpop.permute.xlu0 %830 }
 0x62c   :  { %v838_v29 = vsel %vm280_vm9, %v834_v24, 0.0  ;;  %v841_v34 = vsel %vm280_vm9, %v835_v27, 0.0  ;;  %v837_v35 = vmul.f32 %v831_v28, %v4604_v36  ;;  %v836_v38 = vmul.f32 %v831_v28, %v4609_v37 }
 0x62d   :  { %839 = vadd.xlane.f32.xlu1 %v838_v29  ;;  %842 = vadd.xlane.f32.xlu0 %v841_v34 }
 0x62e   :  { %v847_v39 = vsel %vm280_vm9, %v837_v35, 0.0  ;;  %v844_v40 = vsel %vm280_vm9, %v836_v38, 0.0 }
 0x631   :  { %848 = vadd.xlane.f32.xlu1 %v847_v39  ;;  %845 = vadd.xlane.f32.xlu0 %v844_v40 }
 0x6ba   :  { %v840_v41 = vpop.xlane.xlu1 %839  ;;  %v843_v42 = vpop.xlane.xlu0 %842 }
 0x6bb   :  { %v850_v46 = vmul.f32 0.17677669, %v840_v41  ;;  %v851_v47 = vmul.f32 0.17677669, %v843_v42 }
 0x6bd   :  { %v854_v48 = vmul.f32 1.442695, %v850_v46  ;;  %v856_v52 = vmul.f32 1.442695, %v851_v47 }
 0x6be   :  { %v849_v53 = vpop.xlane.xlu1 %848  ;;  %v846_v55 = vpop.xlane.xlu0 %845 }
 0x6bf   :  { %4144 = vpow2.f32 %v854_v48  ;;  %v853_v56 = vmul.f32 0.17677669, %v849_v53  ;;  %v852_v57 = vmul.f32 0.17677669, %v846_v55 }
 0x6c0   :  { %4146 = vpow2.f32 %v856_v52 }
 0x6c1   :  { %v860_v58 = vmul.f32 1.442695, %v853_v56  ;;  %v858_v59 = vmul.f32 1.442695, %v852_v57 }
 0x6c3   :  { %4148 = vpow2.f32 %v860_v58 }
 0x6c4   :  { %4150 = vpow2.f32 %v858_v59 }
 0x6c9   :  { %v4145_v60 = vpop.eup %4144 }
 0x6ca   :  { %v4147_v61 = vpop.eup %4146  ;;  %v869_v3 = vrot.slane %v4145_v60, %v4561_v44 }
 0x6cb   :  { %v873_v4 = vrot.slane %v4147_v61, %v4564_v45 }
 0x6cd   :  { %v4149_v62 = vpop.eup %4148  ;;  %v874_v43 = vsel %vm243_vm3, %v873_v4, %v869_v3 }
 0x6ce   :  { %v4151_v6 = vpop.eup %4150  ;;  %v882_v7 = vrot.slane %v4149_v62, %v4564_v45 }
 0x6cf   :  { %v878_v11 = vrot.slane %v4151_v6, %v4561_v44 }
 0x6d1   :  { %v883_v15 = vsel %vm243_vm3, %v882_v7, %v878_v11 }
 0x6d2   :  { %v884_v16 = vsel %vm278_vm7, %v883_v15, %v874_v43 }
 0x6d3   :  { %v886_v17 = vsel %vm426_vm10, %v884_v16, 0.0 }
 0x6d4   :  { %887 = vadd.xlane.f32.xlu0 %v886_v17 }
 0x761   :  { %v888_v20 = vpop.xlane.xlu0 %887 }
 0x762   :  { %4152 = vrcp.f32 %v888_v20 }
 0x76c   :  { %v4153_v21 = vpop.eup %4152 }
 0x76d   :  { %v894_v26 = vrot.slane %v4153_v21, %v4637_v32  ;;  %v898_v28 = vrot.slane %v4153_v21, %v4640_v33 }
 0x76f   :  { %v902_v24 = vmul.f32 %v4147_v61, %v894_v26  ;;  %v901_v27 = vmul.f32 %v4145_v60, %v894_v26  ;;  %v903_v29 = vmul.f32 %v4151_v6, %v898_v28  ;;  %v904_v34 = vmul.f32 %v4149_v62, %v898_v28 }
 0x771   :  { %913 = vperm.xlu0 %4127, %v902_v24   ;;  %910 = vperm.xlu1 %4126, %v901_v27  }
 0x775   :  { %916 = vperm.xlu1 %4126, %v903_v29  }
 0x779   :  { %919 = vperm.xlu1 %4126, %v904_v34  }
 0x7f0   :  { %v914_v35 = vpop.permute.xlu0 %913  ;;  %v911_v38 = vpop.permute.xlu1 %910 }
 0x7f1   :  { %v928_v39 = vrot.slane %v914_v35, %v4564_v45  ;;  %v924_v40 = vrot.slane %v911_v38, %v4561_v44 }
 0x7f3   :  { %v929_v41 = vsel %vm243_vm3, %v928_v39, %v924_v40 }
 0x7f4   :  { %v917_v42 = vpop.permute.xlu1 %916  ;;  %v954_v46 = vmul.f32 %v929_v41, %v4502_v5  ;;  %v953_v47 = vmul.f32 %v929_v41, %v4488_v1  ;;  %v955_v53 = vmul.f32 %v929_v41, %v4516_v9  ;;  %v956_v59 = vmul.f32 %v929_v41, %v4530_v13 }
 0x7f5   :  { %v933_v56 = vrot.slane %v917_v42, %v4561_v44 }
 0x7f6   :  { %v964_v48 = vsel %vm189_vm0, %v954_v46, 0.0  ;;  %v961_v52 = vsel %vm189_vm0, %v953_v47, 0.0  ;;  %v967_v58 = vsel %vm189_vm0, %v955_v53, 0.0  ;;  %v970_v60 = vsel %vm189_vm0, %v956_v59, 0.0  ;;  %v797_v47 = vld [vmem:[#allocation2 + $0x2] sm:$0x3] }
 0x7f7   :  { %965 = vadd.xlane.f32.xlu1 %v964_v48  ;;  %962 = vadd.xlane.f32.xlu0 %v961_v52 }
 0x7f8   :  { %v920_v55 = vpop.permute.xlu1 %919 }
 0x7f9   :  { %v937_v57 = vrot.slane %v920_v55, %v4564_v45 }
 0x7fb   :  { %v938_v5 = vsel %vm243_vm3, %v937_v57, %v933_v56  ;;  %968 = vadd.xlane.f32.xlu1 %v967_v58 }
 0x7fc   :  { %v957_v1 = vmul.f32 %v938_v5, %v4483_v0  ;;  %v958_v61 = vmul.f32 %v938_v5, %v4493_v2  ;;  %v959_v3 = vmul.f32 %v938_v5, %v4511_v8  ;;  %v960_v4 = vmul.f32 %v938_v5, %v4525_v12 }
 0x7fe   :  { %v973_v9 = vsel %vm189_vm0, %v957_v1, 0.0  ;;  %v976_v62 = vsel %vm189_vm0, %v958_v61, 0.0  ;;  %v979_v13 = vsel %vm189_vm0, %v959_v3, 0.0  ;;  %v982_v0 = vsel %vm189_vm0, %v960_v4, 0.0 }
 0x7ff   :  { %971 = vadd.xlane.f32.xlu1 %v970_v60  ;;  %974 = vadd.xlane.f32.xlu0 %v973_v9 }
 0x803   :  { %977 = vadd.xlane.f32.xlu0 %v976_v62 }
 0x807   :  { %980 = vadd.xlane.f32.xlu0 %v979_v13 }
 0x80b   :  { %983 = vadd.xlane.f32.xlu0 %v982_v0 }
 0x810   :  { %723 = vrot.lane.b32.xlu1 %v4747_v14, %s4385_s28 }
 0x884   :  { %v966_v6 = vpop.xlane.xlu1 %965  ;;  %v963_v2 = vpop.xlane.xlu0 %962 }
 0x885   :  { %v996_v12 = vrot.slane %v963_v2, %v4561_v44  ;;  %v1000_v14 = vrot.slane %v966_v6, %v4564_v45 }
 0x887   :  { %v1001_v28 = vsel %vm243_vm3, %v1000_v14, %v996_v12 }
 0x888   :  { %v969_v7 = vpop.xlane.xlu1 %968 }
 0x889   :  { %v1005_v20 = vrot.slane %v969_v7, %v4568_v50 }
 0x88b   :  { %v1006_v35 = vsel %vm250_vm5, %v1005_v20, %v1001_v28 }
 0x88c   :  { %v975_v11 = vpop.xlane.xlu0 %974  ;;  %v972_v43 = vpop.xlane.xlu1 %971 }
 0x88d   :  { %v1015_v26 = vrot.slane %v975_v11, %v4561_v44  ;;  %v1010_v24 = vrot.slane %v972_v43, %v4571_v51 }
 0x88f   :  { %v1011_v39 = vsel %vm257_vm6, %v1010_v24, %v1006_v35 }
 0x890   :  { %v978_v15 = vpop.xlane.xlu0 %977  ;;  %v4799_v16 = vpop.permute.xlu1 %723 }
 0x891   :  { %3832 = vmatmul.mubr.msk.f32.vlgmr.msra.gmra.mrb[2].mxu1 %vm280_vm9, %v4799_v16  ;;  %v1019_v17 = vrot.slane %v978_v15, %v4564_v45 }
 0x892   :  { %4019 = vmatpush3.bf16.msra.mxu1 %v4536_v18  ;;  %3853 = vmatprep.mubr.msk.f32.mxu1 %vm4380_vm1, %v4381_v23 }
 0x893   :  { %4020 = vmatprep.subr.bf16.mxu1 %v4379_v19  ;;  %v1020_v29 = vsel %vm243_vm3, %v1019_v17, %v1015_v26 }
 0x894   :  { %v981_v8 = vpop.xlane.xlu0 %980 }
 0x895   :  { %v1024_v21 = vrot.slane %v981_v8, %v4568_v50 }
 0x896   :  { %4022 = vmatpush3.bf16.msra.mxu1 %v4541_v22 }
 0x897   :  { %4023 = vmatprep.subr.bf16.mxu1 %v4379_v19  ;;  %v1025_v38 = vsel %vm250_vm5, %v1024_v21, %v1020_v29 }
 0x898   :  { %v984_v27 = vpop.xlane.xlu0 %983 }
 0x899   :  { %v1029_v34 = vrot.slane %v984_v27, %v4571_v51 }
 0x89b   :  { %v1030_v40 = vsel %vm257_vm6, %v1029_v34, %v1025_v38 }
 0x89c   :  { %v1031_v41 = vsel %vm278_vm7, %v1030_v40, %v1011_v39 }
 0x89d   :  { %3843 = vmatmul.mubr.msk.f32.vlgmr.msra.gmra.mrb[2].mxu0 %vm280_vm9, %v1031_v41 }
 0x89e   :  { %4031 = vmatpush3.bf16.msra.mxu0 %v4536_v18  ;;  %3875 = vmatprep.mubr.msk.f32.mxu0 %vm4380_vm1, %v4381_v23 }
 0x89f   :  { %4032 = vmatprep.subr.bf16.mxu0 %v4379_v19 }
 0x8a2   :  { %4034 = vmatpush3.bf16.msra.mxu0 %v4541_v22 }
 0x8a3   :  { %4035 = vmatprep.subr.bf16.mxu0 %v4379_v19 }
 0x964   :  { %v793_v42 = vpop.f32.mrb[2].mxu1 }
 0x965   :  { %v3833_v46 = vpop.f32.mrb[3].mxu1  ;;  %v1104_v48 = vadd.f32 %v797_v47, %v793_v42 }
 0x970   :  { %v1100_v52 = vpop.f32.mrb[2].mxu0 }
 0x971   :  { %v1105_v53 = vadd.f32 %v1104_v48, %v1100_v52  ;;  %v3844_v55 = vpop.f32.mrb[3].mxu0 }
 0x973   :  { %v1106_v56 = vmul.f32 2.0, %v1105_v53 }
 0x975   :  { %v1107_v57 = vsel %vm225_vm12, %v1105_v53, %v1106_v56 }
 0x976   :  { %v3665_v58 = vmul.f32 -1.442695, %v1107_v57 }
 0x978   :  { %4154 = vpow2.f32 %v3665_v58 }
 0x982   :  { %v4155_v59 = vpop.eup %4154 }
 0x983   :  { %v1111_v5 = vadd.f32 1.0, %v4155_v59 }
 0x985   :  { %4156 = vrcp.f32 %v1111_v5 }
 0x98f   :  { %v4157_v1 = vpop.eup %4156 }
 0x990   :  { %v1114_v60 = vmul.f32 2.0, %v4157_v1 }
 0x992   :  { %v3666_v9 = vadd.f32 -1.0, %v1114_v60 }
 0x994   :  { %v1116_v61 = vsel %vm225_vm12, %v4157_v1, %v3666_v9 }
 0x995   :  { %1119 = vrot.lane.b32.xlu0 %v1116_v61, %s4383_s6  ;;  %v1117_v13 = vmul.f32 %v1116_v61, %v4740_v63 }
 0xa07   :  { %v1120_v62 = vpop.permute.xlu0 %1119 }
 0xa08   :  { %v1122_v3 = vmul.f32 %v1120_v62, %v1116_v61 }
 0xa0a   :  { %1124 = vrot.lane.b32.xlu1 %v1122_v3, %s4383_s6 }
 0xa7c   :  { %v1125_v4 = vpop.permute.xlu1 %1124 }
 0xa7d   :  { %v4838_v0 = vadd.f32 %v1125_v4, %v1117_v13 }
 0xa7f   :  { %4158 = vtanh.f32 %v4838_v0 }
 0xa89   :  { %v4159_v6 = vpop.eup %4158 }
 0xa8a   :  { %1130 = vrot.lane.b32.xlu1 %v4159_v6, %s4383_s6 }
 0xafc   :  { %v1131_v2 = vpop.permute.xlu1 %1130 }
 0xafd   :  { %v4842_v7 = vmul.f32 %v1131_v2, %v1116_v61 }
 0xaff   :  { %v1216_v11 = vrot.slane %v4842_v7, %v4745_v10 }
 0xb01   :  { %v1224_v43 = vrot.slane %v1216_v11, %v4745_v10  ;;  %v1217_v15 = vcombine.high %v1216_v11, %v1216_v11 }
 0xb03   :  { %v1235_v8 = vrot.slane %v1224_v43, %v4637_v32  ;;  %v1231_v63 = vrot.slane %v1217_v15, %v4745_v10 }
 0xb05   :  { %1240 = vrot.lane.b32.xlu0 %v1235_v8, %s4385_s28  ;;  %v1239_v12 = vrot.slane %v1231_v63, %v4637_v32 }
 0xb07   :  { %1242 = vrot.lane.b32.xlu1 %v1239_v12, %s4385_s28 }
 0xb77   :  { %v1241_v14 = vpop.permute.xlu0 %1240 }
 0xb78   :  { %v1246_v17 = vmul.f32 %v1241_v14, %v4595_v31  ;;  %v1247_v20 = vmul.f32 %v1241_v14, %v4590_v30 }
 0xb79   :  { %v1243_v21 = vpop.permute.xlu1 %1242 }
 0xb7a   :  { %v1250_v26 = vsel %vm280_vm9, %v1246_v17, 0.0  ;;  %v1253_v24 = vsel %vm280_vm9, %v1247_v20, 0.0  ;;  %v1248_v27 = vmul.f32 %v1243_v21, %v4609_v37  ;;  %v1249_v29 = vmul.f32 %v1243_v21, %v4604_v36  ;;  %v4876_v20 = vld [vmem:[%s5514_s1 + $0x8] sm:$0xff] }
 0xb7b   :  { %1251 = vadd.xlane.f32.xlu0 %v1250_v26  ;;  %1254 = vadd.xlane.f32.xlu1 %v1253_v24  ;;  %v4882_v26 = vld [vmem:[%s5514_s1] sm:$0xff] }
 0xb7c   :  { %v1256_v28 = vsel %vm280_vm9, %v1248_v27, 0.0  ;;  %v1259_v34 = vsel %vm280_vm9, %v1249_v29, 0.0 }
 0xb7f   :  { %1257 = vadd.xlane.f32.xlu0 %v1256_v28 }
 0xb83   :  { %1260 = vadd.xlane.f32.xlu0 %v1259_v34 }
 0xc08   :  { %v1252_v31 = vpop.xlane.xlu0 %1251  ;;  %v1255_v35 = vpop.xlane.xlu1 %1254 }
 0xc09   :  { %v1262_v30 = vmul.f32 0.17677669, %v1252_v31  ;;  %v1263_v38 = vmul.f32 0.17677669, %v1255_v35  ;;  %v4893_v35 = vld [vmem:[%s5514_s1 + $0x28] sm:$0xff] }
 0xc0b   :  { %v1266_v39 = vmul.f32 1.442695, %v1262_v30  ;;  %v1268_v41 = vmul.f32 1.442695, %v1263_v38  ;;  %v4899_v38 = vld [vmem:[%s5514_s1 + $0x20] sm:$0xff] }
 0xc0c   :  { %v1258_v40 = vpop.xlane.xlu0 %1257 }
 0xc0d   :  { %v1264_v42 = vmul.f32 0.17677669, %v1258_v40  ;;  %4160 = vpow2.f32 %v1266_v39 }
 0xc0e   :  { %4162 = vpow2.f32 %v1268_v41 }
 0xc0f   :  { %v1270_v46 = vmul.f32 1.442695, %v1264_v42  ;;  %v4907_v42 = vld [vmem:[%s5514_s1 + $0x30] sm:$0xff] }
 0xc10   :  { %v1261_v37 = vpop.xlane.xlu0 %1260 }
 0xc11   :  { %v1265_v47 = vmul.f32 0.17677669, %v1261_v37  ;;  %4164 = vpow2.f32 %v1270_v46  ;;  %v4913_v37 = vld [vmem:[%s5514_s1 + $0x10] sm:$0xff] }
 0xc13   :  { %v1272_v48 = vmul.f32 1.442695, %v1265_v47 }
 0xc15   :  { %4166 = vpow2.f32 %v1272_v48 }
 0xc17   :  { %v4161_v36 = vpop.eup %4160 }
 0xc18   :  { %v4163_v52 = vpop.eup %4162  ;;  %v1281_v55 = vrot.slane %v4161_v36, %v4561_v44 }
 0xc19   :  { %v1285_v56 = vrot.slane %v4163_v52, %v4564_v45 }
 0xc1b   :  { %v4165_v53 = vpop.eup %4164  ;;  %v1286_v5 = vsel %vm243_vm3, %v1285_v56, %v1281_v55  ;;  %v4927_v55 = vld [vmem:[%s5514_s1 + $0x18] sm:$0xff] }
 0xc1c   :  { %v1290_v58 = vrot.slane %v4165_v53, %v4561_v44 }
 0xc1f   :  { %v4167_v57 = vpop.eup %4166 }
 0xc20   :  { %v1294_v59 = vrot.slane %v4167_v57, %v4564_v45 }
 0xc22   :  { %v1295_v1 = vsel %vm243_vm3, %v1294_v59, %v1290_v58 }
 0xc23   :  { %v1296_v60 = vsel %vm278_vm7, %v1295_v1, %v1286_v5 }
 0xc24   :  { %v1298_v9 = vsel %vm426_vm10, %v1296_v60, 0.0 }
 0xc25   :  { %1299 = vadd.xlane.f32.xlu1 %v1298_v9 }
 0xcb2   :  { %v1300_v61 = vpop.xlane.xlu1 %1299 }
 0xcb3   :  { %4168 = vrcp.f32 %v1300_v61 }
 0xcbd   :  { %v4169_v62 = vpop.eup %4168 }
 0xcbe   :  { %v1306_v3 = vrot.slane %v4169_v62, %v4637_v32  ;;  %v1310_v6 = vrot.slane %v4169_v62, %v4640_v33 }
 0xcc0   :  { %v1314_v13 = vmul.f32 %v4163_v52, %v1306_v3  ;;  %v1313_v4 = vmul.f32 %v4161_v36, %v1306_v3  ;;  %v1315_v2 = vmul.f32 %v4165_v53, %v1310_v6  ;;  %v1316_v11 = vmul.f32 %v4167_v57, %v1310_v6  ;;  %v4921_v52 = vld [vmem:[%s5514_s1 + $0x38] sm:$0xff] }
 0xcc2   :  { %1325 = vperm.xlu1 %4126, %v1314_v13   ;;  %1322 = vperm.xlu0 %4127, %v1313_v4  }
 0xcc6   :  { %1328 = vperm.xlu1 %4126, %v1315_v2   ;;  %1331 = vperm.xlu0 %4127, %v1316_v11  }
 0xd41   :  { %v1326_v43 = vpop.permute.xlu1 %1325  ;;  %v1323_v15 = vpop.permute.xlu0 %1322 }
 0xd42   :  { %v1340_v8 = vrot.slane %v1326_v43, %v4564_v45  ;;  %v1336_v63 = vrot.slane %v1323_v15, %v4561_v44 }
 0xd44   :  { %v1341_v12 = vsel %vm243_vm3, %v1340_v8, %v1336_v63 }
 0xd45   :  { %v1329_v14 = vpop.permute.xlu1 %1328  ;;  %v1332_v17 = vpop.permute.xlu0 %1331  ;;  %v1366_v21 = vmul.f32 %v4876_v20, %v1341_v12  ;;  %v1365_v24 = vmul.f32 %v4882_v26, %v1341_v12  ;;  %v1367_v47 = vmul.f32 %v4913_v37, %v1341_v12  ;;  %v1368_v56 = vmul.f32 %v4927_v55, %v1341_v12 }
 0xd46   :  { %v1345_v27 = vrot.slane %v1329_v14, %v4561_v44  ;;  %v1349_v28 = vrot.slane %v1332_v17, %v4564_v45 }
 0xd47   :  { %v1376_v29 = vsel %vm189_vm0, %v1366_v21, 0.0  ;;  %v1373_v34 = vsel %vm189_vm0, %v1365_v24, 0.0  ;;  %v1379_v36 = vsel %vm189_vm0, %v1367_v47, 0.0  ;;  %v1382_v58 = vsel %vm189_vm0, %v1368_v56, 0.0 }
 0xd48   :  { %v1350_v31 = vsel %vm243_vm3, %v1349_v28, %v1345_v27  ;;  %1377 = vadd.xlane.f32.xlu0 %v1376_v29  ;;  %1374 = vadd.xlane.f32.xlu1 %v1373_v34  ;;  %v1209_v29 = vld [vmem:[#allocation2 + $0x4] sm:$0x3] }
 0xd49   :  { %v1370_v30 = vmul.f32 %v4893_v35, %v1350_v31  ;;  %v1369_v39 = vmul.f32 %v4899_v38, %v1350_v31  ;;  %v1371_v46 = vmul.f32 %v4907_v42, %v1350_v31  ;;  %v1372_v53 = vmul.f32 %v4921_v52, %v1350_v31 }
 0xd4b   :  { %v1388_v40 = vsel %vm189_vm0, %v1370_v30, 0.0  ;;  %v1385_v41 = vsel %vm189_vm0, %v1369_v39, 0.0  ;;  %v1391_v48 = vsel %vm189_vm0, %v1371_v46, 0.0  ;;  %v1394_v57 = vsel %vm189_vm0, %v1372_v53, 0.0 }
 0xd4c   :  { %1389 = vadd.xlane.f32.xlu1 %v1388_v40  ;;  %1386 = vadd.xlane.f32.xlu0 %v1385_v41 }
 0xd50   :  { %1392 = vadd.xlane.f32.xlu1 %v1391_v48  ;;  %1380 = vadd.xlane.f32.xlu0 %v1379_v36 }
 0xd54   :  { %1395 = vadd.xlane.f32.xlu1 %v1394_v57  ;;  %1383 = vadd.xlane.f32.xlu0 %v1382_v58 }
 0xd6a   :  { %1135 = vrot.lane.b32.xlu0 %v4842_v7, %s4385_s28 }
 0xdd5   :  { %v1375_v59 = vpop.xlane.xlu1 %1374  ;;  %v1378_v5 = vpop.xlane.xlu0 %1377 }
 0xdd6   :  { %v1408_v13 = vrot.slane %v1375_v59, %v4561_v44  ;;  %v1412_v4 = vrot.slane %v1378_v5, %v4564_v45 }
 0xdd8   :  { %v1413_v12 = vsel %vm243_vm3, %v1412_v4, %v1408_v13 }
 0xdd9   :  { %v1390_v1 = vpop.xlane.xlu1 %1389  ;;  %v1387_v60 = vpop.xlane.xlu0 %1386 }
 0xdda   :  { %v1431_v6 = vrot.slane %v1390_v1, %v4564_v45  ;;  %v1427_v2 = vrot.slane %v1387_v60, %v4561_v44 }
 0xddc   :  { %v1432_v14 = vsel %vm243_vm3, %v1431_v6, %v1427_v2 }
 0xddd   :  { %v1393_v9 = vpop.xlane.xlu1 %1392  ;;  %v1381_v61 = vpop.xlane.xlu0 %1380 }
 0xdde   :  { %v1436_v11 = vrot.slane %v1393_v9, %v4568_v50  ;;  %v1417_v43 = vrot.slane %v1381_v61, %v4568_v50 }
 0xde0   :  { %v1437_v17 = vsel %vm250_vm5, %v1436_v11, %v1432_v14  ;;  %v1418_v21 = vsel %vm250_vm5, %v1417_v43, %v1413_v12  ;;  %v4987_v11 = vld [vmem:[%s5515_s2] sm:$0xff] }
 0xde1   :  { %v1384_v62 = vpop.xlane.xlu0 %1383  ;;  %v1396_v3 = vpop.xlane.xlu1 %1395 }
 0xde2   :  { %v1441_v8 = vrot.slane %v1396_v3, %v4571_v51  ;;  %v1422_v63 = vrot.slane %v1384_v62, %v4571_v51 }
 0xde4   :  { %v1442_v24 = vsel %vm257_vm6, %v1441_v8, %v1437_v17  ;;  %v1423_v27 = vsel %vm257_vm6, %v1422_v63, %v1418_v21  ;;  %v5001_v17 = vld [vmem:[%s5515_s2 + $0x18] sm:$0xff] }
 0xde5   :  { %v1136_v15 = vpop.permute.xlu0 %1135  ;;  %v1443_v28 = vsel %vm278_vm7, %v1442_v24, %v1423_v27  ;;  %v5007_v24 = vld [vmem:[%s5515_s2 + $0x10] sm:$0xff] }
 0xde6   :  { %3854 = vmatmul.mubr.msk.f32.vlgmr.msra.gmra.mrb[4].mxu1 %vm280_vm9, %v1136_v15  ;;  %v4993_v15 = vld [vmem:[%s5515_s2 + $0x8] sm:$0xff] }
 0xde7   :  { %4025 = vmatpush3.bf16.msra.mxu1 %v4695_v49  ;;  %3864 = vmatprep.mubr.msk.f32.mxu1 %vm4380_vm1, %v4381_v23 }
 0xde8   :  { %4026 = vmatprep.subr.bf16.mxu1 %v4379_v19 }
 0xdeb   :  { %4028 = vmatpush3.bf16.msra.mxu1 %v4701_v54 }
 0xdec   :  { %4041 = vmatprep.subr.bf16.mxu1 %v4379_v19 }
 0xdee   :  { %3865 = vmatmul.mubr.msk.f32.vlgmr.msra.gmra.mrb[4].mxu1 %vm280_vm9, %v1443_v28 }
 0xdef   :  { %4043 = vmatpush3.bf16.msra.mxu1 %v4536_v18  ;;  %3897 = vmatprep.mubr.msk.f32.mxu1 %vm4380_vm1, %v4381_v23 }
 0xdf0   :  { %4044 = vmatprep.subr.bf16.mxu1 %v4379_v19 }
 0xdf3   :  { %4046 = vmatpush3.bf16.msra.mxu1 %v4541_v22 }
 0xdf4   :  { %4047 = vmatprep.subr.bf16.mxu1 %v4379_v19 }
 0xec1   :  { %v1512_v34 = vpop.f32.mrb[4].mxu1 }
 0xec2   :  { %v4092_v31 = vadd.f32 %v1512_v34, %v1209_v29  ;;  %v3866_v30 = vpop.f32.mrb[5].mxu1 }
 0xec4   :  { %v1518_v39 = vmul.f32 2.0, %v4092_v31 }
 0xec6   :  { %v1519_v40 = vsel %vm225_vm12, %v4092_v31, %v1518_v39 }
 0xec7   :  { %v3669_v41 = vmul.f32 -1.442695, %v1519_v40 }
 0xec9   :  { %4170 = vpow2.f32 %v3669_v41 }
 0xed3   :  { %v4171_v46 = vpop.eup %4170 }
 0xed4   :  { %v1523_v47 = vadd.f32 1.0, %v4171_v46 }
 0xed6   :  { %4172 = vrcp.f32 %v1523_v47 }
 0xee0   :  { %v4173_v48 = vpop.eup %4172 }
 0xee1   :  { %v1526_v36 = vmul.f32 2.0, %v4173_v48 }
 0xee3   :  { %v3670_v53 = vadd.f32 -1.0, %v1526_v36 }
 0xee5   :  { %v1528_v56 = vsel %vm225_vm12, %v4173_v48, %v3670_v53 }
 0xee6   :  { %1531 = vrot.lane.b32.xlu1 %v1528_v56, %s4383_s6  ;;  %v1529_v59 = vmul.f32 %v1528_v56, %v4838_v0 }
 0xf58   :  { %v1532_v57 = vpop.permute.xlu1 %1531 }
 0xf59   :  { %v1534_v58 = vmul.f32 %v1532_v57, %v1528_v56 }
 0xf5b   :  { %1536 = vrot.lane.b32.xlu1 %v1534_v58, %s4383_s6 }
 0xfcd   :  { %v1537_v5 = vpop.permute.xlu1 %1536 }
 0xfce   :  { %v4970_v1 = vadd.f32 %v1537_v5, %v1529_v59 }
 0xfd0   :  { %4174 = vtanh.f32 %v4970_v1 }
 0xfda   :  { %v4175_v60 = vpop.eup %4174 }
 0xfdb   :  { %1542 = vrot.lane.b32.xlu0 %v4175_v60, %s4383_s6 }
0x104d   :  { %v1543_v9 = vpop.permute.xlu0 %1542 }
0x104e   :  { %v4974_v61 = vmul.f32 %v1543_v9, %v1528_v56 }
0x1050   :  { %v1628_v62 = vrot.slane %v4974_v61, %v4745_v10 }
0x1052   :  { %v1636_v3 = vrot.slane %v1628_v62, %v4745_v10  ;;  %v1629_v13 = vcombine.high %v1628_v62, %v1628_v62 }
0x1054   :  { %v1647_v4 = vrot.slane %v1636_v3, %v4637_v32  ;;  %v1643_v0 = vrot.slane %v1629_v13, %v4745_v10 }
0x1056   :  { %1652 = vrot.lane.b32.xlu1 %v1647_v4, %s4385_s28  ;;  %v1651_v6 = vrot.slane %v1643_v0, %v4637_v32 }
0x1058   :  { %1654 = vrot.lane.b32.xlu0 %v1651_v6, %s4385_s28 }
0x10c8   :  { %v1653_v2 = vpop.permute.xlu1 %1652 }
0x10c9   :  { %v1658_v43 = vmul.f32 %v4987_v11, %v1653_v2  ;;  %v1659_v8 = vmul.f32 %v4993_v15, %v1653_v2 }
0x10ca   :  { %v1655_v63 = vpop.permute.xlu0 %1654 }
0x10cb   :  { %v1662_v12 = vsel %vm280_vm9, %v1658_v43, 0.0  ;;  %v1665_v14 = vsel %vm280_vm9, %v1659_v8, 0.0  ;;  %v1661_v21 = vmul.f32 %v5001_v17, %v1655_v63  ;;  %v1660_v27 = vmul.f32 %v5007_v24, %v1655_v63 }
0x10cc   :  { %1663 = vadd.xlane.f32.xlu1 %v1662_v12  ;;  %1666 = vadd.xlane.f32.xlu0 %v1665_v14 }
0x10cd   :  { %v1671_v28 = vsel %vm280_vm9, %v1661_v21, 0.0  ;;  %v1668_v29 = vsel %vm280_vm9, %v1660_v27, 0.0 }
0x10d0   :  { %1672 = vadd.xlane.f32.xlu1 %v1671_v28  ;;  %1669 = vadd.xlane.f32.xlu0 %v1668_v29 }
0x1159   :  { %v1664_v34 = vpop.xlane.xlu1 %1663  ;;  %v1667_v31 = vpop.xlane.xlu0 %1666 }
0x115a   :  { %v1674_v30 = vmul.f32 0.17677669, %v1664_v34  ;;  %v1675_v39 = vmul.f32 0.17677669, %v1667_v31 }
0x115c   :  { %v1678_v40 = vmul.f32 1.442695, %v1674_v30  ;;  %v1680_v41 = vmul.f32 1.442695, %v1675_v39 }
0x115d   :  { %v1673_v46 = vpop.xlane.xlu1 %1672  ;;  %v1670_v47 = vpop.xlane.xlu0 %1669 }
0x115e   :  { %4176 = vpow2.f32 %v1678_v40  ;;  %v1677_v48 = vmul.f32 0.17677669, %v1673_v46  ;;  %v1676_v36 = vmul.f32 0.17677669, %v1670_v47 }
0x115f   :  { %4178 = vpow2.f32 %v1680_v41 }
0x1160   :  { %v1684_v53 = vmul.f32 1.442695, %v1677_v48  ;;  %v1682_v56 = vmul.f32 1.442695, %v1676_v36 }
0x1162   :  { %4180 = vpow2.f32 %v1684_v53 }
0x1163   :  { %4182 = vpow2.f32 %v1682_v56 }
0x1168   :  { %v4177_v57 = vpop.eup %4176 }
0x1169   :  { %v4179_v58 = vpop.eup %4178  ;;  %v1693_v5 = vrot.slane %v4177_v57, %v4561_v44 }
0x116a   :  { %v1697_v60 = vrot.slane %v4179_v58, %v4564_v45 }
0x116c   :  { %v4181_v59 = vpop.eup %4180  ;;  %v1698_v13 = vsel %vm243_vm3, %v1697_v60, %v1693_v5 }
0x116d   :  { %v4183_v9 = vpop.eup %4182  ;;  %v1706_v62 = vrot.slane %v4181_v59, %v4564_v45 }
0x116e   :  { %v1702_v3 = vrot.slane %v4183_v9, %v4561_v44 }
0x1170   :  { %v1707_v4 = vsel %vm243_vm3, %v1706_v62, %v1702_v3 }
0x1171   :  { %v1708_v0 = vsel %vm278_vm7, %v1707_v4, %v1698_v13 }
0x1172   :  { %v1710_v6 = vsel %vm426_vm10, %v1708_v0, 0.0 }
0x1173   :  { %1711 = vadd.xlane.f32.xlu0 %v1710_v6 }
0x1200   :  { %v1712_v2 = vpop.xlane.xlu0 %1711 }
0x1201   :  { %4184 = vrcp.f32 %v1712_v2 }
0x120b   :  { %v4185_v43 = vpop.eup %4184 }
0x120c   :  { %v1718_v8 = vrot.slane %v4185_v43, %v4637_v32  ;;  %v1722_v14 = vrot.slane %v4185_v43, %v4640_v33 }
0x120e   :  { %v1726_v63 = vmul.f32 %v4179_v58, %v1718_v8  ;;  %v1725_v12 = vmul.f32 %v4177_v57, %v1718_v8  ;;  %v1727_v21 = vmul.f32 %v4183_v9, %v1722_v14  ;;  %v1728_v27 = vmul.f32 %v4181_v59, %v1722_v14 }
0x1210   :  { %1737 = vperm.xlu0 %4127, %v1726_v63   ;;  %1734 = vperm.xlu1 %4126, %v1725_v12  }
0x1214   :  { %1740 = vperm.xlu1 %4126, %v1727_v21  }
0x1218   :  { %1743 = vperm.xlu1 %4126, %v1728_v27  }
0x128f   :  { %v1738_v28 = vpop.permute.xlu0 %1737  ;;  %v1735_v29 = vpop.permute.xlu1 %1734 }
0x1290   :  { %v1752_v34 = vrot.slane %v1738_v28, %v4564_v45  ;;  %v1748_v31 = vrot.slane %v1735_v29, %v4561_v44 }
0x1292   :  { %v1753_v30 = vsel %vm243_vm3, %v1752_v34, %v1748_v31 }
0x1293   :  { %v1741_v39 = vpop.permute.xlu1 %1740  ;;  %v1778_v40 = vmul.f32 %v4876_v20, %v1753_v30  ;;  %v1777_v41 = vmul.f32 %v4882_v26, %v1753_v30  ;;  %v1779_v48 = vmul.f32 %v4913_v37, %v1753_v30  ;;  %v1780_v58 = vmul.f32 %v4927_v55, %v1753_v30 }
0x1294   :  { %v1757_v53 = vrot.slane %v1741_v39, %v4561_v44 }
0x1295   :  { %v1788_v46 = vsel %vm189_vm0, %v1778_v40, 0.0  ;;  %v1785_v47 = vsel %vm189_vm0, %v1777_v41, 0.0  ;;  %v1791_v57 = vsel %vm189_vm0, %v1779_v48, 0.0  ;;  %v1794_v60 = vsel %vm189_vm0, %v1780_v58, 0.0 }
0x1296   :  { %1789 = vadd.xlane.f32.xlu1 %v1788_v46  ;;  %1786 = vadd.xlane.f32.xlu0 %v1785_v47 }
0x1297   :  { %v1744_v36 = vpop.permute.xlu1 %1743 }
0x1298   :  { %v1761_v56 = vrot.slane %v1744_v36, %v4564_v45 }
0x129a   :  { %v1762_v59 = vsel %vm243_vm3, %v1761_v56, %v1757_v53  ;;  %1792 = vadd.xlane.f32.xlu1 %v1791_v57 }
0x129b   :  { %v1781_v5 = vmul.f32 %v4899_v38, %v1762_v59  ;;  %v1782_v62 = vmul.f32 %v4893_v35, %v1762_v59  ;;  %v1783_v13 = vmul.f32 %v4907_v42, %v1762_v59  ;;  %v1784_v0 = vmul.f32 %v4921_v52, %v1762_v59  ;;  %v1621_v59 = vld [vmem:[#allocation2 + $0x6] sm:$0x3] }
0x129d   :  { %v1797_v9 = vsel %vm189_vm0, %v1781_v5, 0.0  ;;  %v1800_v3 = vsel %vm189_vm0, %v1782_v62, 0.0  ;;  %v1803_v4 = vsel %vm189_vm0, %v1783_v13, 0.0  ;;  %v1806_v6 = vsel %vm189_vm0, %v1784_v0, 0.0 }
0x129e   :  { %1795 = vadd.xlane.f32.xlu1 %v1794_v60  ;;  %1798 = vadd.xlane.f32.xlu0 %v1797_v9 }
0x12a2   :  { %1801 = vadd.xlane.f32.xlu0 %v1800_v3 }
0x12a6   :  { %1804 = vadd.xlane.f32.xlu0 %v1803_v4 }
0x12aa   :  { %1807 = vadd.xlane.f32.xlu0 %v1806_v6 }
0x12af   :  { %1547 = vrot.lane.b32.xlu1 %v4974_v61, %s4385_s28 }
0x1323   :  { %v1790_v2 = vpop.xlane.xlu1 %1789  ;;  %v1787_v43 = vpop.xlane.xlu0 %1786 }
0x1324   :  { %v1820_v28 = vrot.slane %v1787_v43, %v4561_v44  ;;  %v1824_v29 = vrot.slane %v1790_v2, %v4564_v45 }
0x1326   :  { %v1825_v46 = vsel %vm243_vm3, %v1824_v29, %v1820_v28 }
0x1327   :  { %v1793_v8 = vpop.xlane.xlu1 %1792 }
0x1328   :  { %v1829_v31 = vrot.slane %v1793_v8, %v4568_v50 }
0x132a   :  { %v1830_v36 = vsel %vm250_vm5, %v1829_v31, %v1825_v46 }
0x132b   :  { %v1799_v63 = vpop.xlane.xlu0 %1798  ;;  %v1796_v12 = vpop.xlane.xlu1 %1795 }
0x132c   :  { %v1839_v39 = vrot.slane %v1799_v63, %v4561_v44  ;;  %v1834_v40 = vrot.slane %v1796_v12, %v4571_v51 }
0x132e   :  { %v1835_v56 = vsel %vm257_vm6, %v1834_v40, %v1830_v36 }
0x132f   :  { %v1802_v14 = vpop.xlane.xlu0 %1801  ;;  %v1548_v21 = vpop.permute.xlu1 %1547 }
0x1330   :  { %3876 = vmatmul.mubr.msk.f32.vlgmr.msra.gmra.mrb[4].mxu0 %vm280_vm9, %v1548_v21  ;;  %v1843_v34 = vrot.slane %v1802_v14, %v4564_v45 }
0x1331   :  { %4037 = vmatpush3.bf16.msra.mxu0 %v4695_v49  ;;  %3886 = vmatprep.mubr.msk.f32.mxu0 %vm4380_vm1, %v4381_v23 }
0x1332   :  { %4038 = vmatprep.subr.bf16.mxu0 %v4379_v19  ;;  %v1844_v47 = vsel %vm243_vm3, %v1843_v34, %v1839_v39 }
0x1333   :  { %v1805_v27 = vpop.xlane.xlu0 %1804 }
0x1334   :  { %v1848_v30 = vrot.slane %v1805_v27, %v4568_v50 }
0x1335   :  { %4040 = vmatpush3.bf16.msra.mxu0 %v4701_v54 }
0x1336   :  { %4053 = vmatprep.subr.bf16.mxu0 %v4379_v19  ;;  %v1849_v53 = vsel %vm250_vm5, %v1848_v30, %v1844_v47 }
0x1337   :  { %v1808_v41 = vpop.xlane.xlu0 %1807 }
0x1338   :  { %v1853_v48 = vrot.slane %v1808_v41, %v4571_v51 }
0x133a   :  { %v1854_v57 = vsel %vm257_vm6, %v1853_v48, %v1849_v53 }
0x133b   :  { %v1855_v58 = vsel %vm278_vm7, %v1854_v57, %v1835_v56 }
0x133c   :  { %3887 = vmatmul.mubr.msk.f32.vlgmr.msra.gmra.mrb[4].mxu0 %vm280_vm9, %v1855_v58 }
0x133d   :  { %4055 = vmatpush3.bf16.msra.mxu0 %v4536_v18  ;;  %3919 = vmatprep.mubr.msk.f32.mxu0 %vm4380_vm1, %v4381_v23 }
0x133e   :  { %4056 = vmatprep.subr.bf16.mxu0 %v4379_v19 }
0x1341   :  { %4058 = vmatpush3.bf16.msra.mxu0 %v4541_v22 }
0x1342   :  { %4059 = vmatprep.subr.bf16.mxu0 %v4379_v19 }
0x140f   :  { %v1924_v5 = vpop.f32.mrb[4].mxu0 }
0x1410   :  { %v4093_v60 = vadd.f32 %v1924_v5, %v1621_v59  ;;  %v3888_v9 = vpop.f32.mrb[5].mxu0 }
0x1412   :  { %v1930_v62 = vmul.f32 2.0, %v4093_v60 }
0x1414   :  { %v1931_v3 = vsel %vm225_vm12, %v4093_v60, %v1930_v62 }
0x1415   :  { %v3673_v13 = vmul.f32 -1.442695, %v1931_v3 }
0x1417   :  { %4186 = vpow2.f32 %v3673_v13 }
0x1421   :  { %v4187_v4 = vpop.eup %4186 }
0x1422   :  { %v1935_v0 = vadd.f32 1.0, %v4187_v4 }
0x1424   :  { %4188 = vrcp.f32 %v1935_v0 }
0x142e   :  { %v4189_v6 = vpop.eup %4188 }
0x142f   :  { %v1938_v2 = vmul.f32 2.0, %v4189_v6 }
0x1431   :  { %v3674_v43 = vadd.f32 -1.0, %v1938_v2 }
0x1433   :  { %v1940_v8 = vsel %vm225_vm12, %v4189_v6, %v3674_v43 }
0x1434   :  { %1943 = vrot.lane.b32.xlu0 %v1940_v8, %s4383_s6  ;;  %v1941_v14 = vmul.f32 %v1940_v8, %v4970_v1 }
0x14a6   :  { %v1944_v63 = vpop.permute.xlu0 %1943 }
0x14a7   :  { %v1946_v12 = vmul.f32 %v1944_v63, %v1940_v8 }
0x14a9   :  { %1948 = vrot.lane.b32.xlu1 %v1946_v12, %s4383_s6 }
0x151b   :  { %v1949_v21 = vpop.permute.xlu1 %1948 }
0x151c   :  { %v5082_v27 = vadd.f32 %v1949_v21, %v1941_v14 }
0x151e   :  { %4190 = vtanh.f32 %v5082_v27 }
0x1528   :  { %v4191_v28 = vpop.eup %4190 }
0x1529   :  { %1954 = vrot.lane.b32.xlu1 %v4191_v28, %s4383_s6 }
0x159b   :  { %v1955_v29 = vpop.permute.xlu1 %1954 }
0x159c   :  { %v5086_v34 = vmul.f32 %v1955_v29, %v1940_v8 }
0x159e   :  { %v2040_v31 = vrot.slane %v5086_v34, %v4745_v10 }
0x15a0   :  { %v2041_v30 = vcombine.high %v2040_v31, %v2040_v31  ;;  %v2048_v39 = vrot.slane %v2040_v31, %v4745_v10 }
0x15a2   :  { %v2055_v40 = vrot.slane %v2041_v30, %v4745_v10  ;;  %v2059_v1 = vrot.slane %v2048_v39, %v4637_v32 }
0x15a4   :  { %2064 = vrot.lane.b32.xlu0 %v2059_v1, %s4385_s28  ;;  %v2063_v41 = vrot.slane %v2055_v40, %v4637_v32 }
0x15a6   :  { %2066 = vrot.lane.b32.xlu1 %v2063_v41, %s4385_s28 }
0x1616   :  { %v2065_v46 = vpop.permute.xlu0 %2064 }
0x1617   :  { %v2070_v47 = vmul.f32 %v4987_v11, %v2065_v46  ;;  %v2071_v48 = vmul.f32 %v4993_v15, %v2065_v46 }
0x1618   :  { %v2067_v36 = vpop.permute.xlu1 %2066 }
0x1619   :  { %v2072_v53 = vmul.f32 %v5007_v24, %v2067_v36  ;;  %v2074_v56 = vsel %vm280_vm9, %v2070_v47, 0.0  ;;  %v2077_v57 = vsel %vm280_vm9, %v2071_v48, 0.0  ;;  %v2073_v58 = vmul.f32 %v5001_v17, %v2067_v36 }
0x161a   :  { %2075 = vadd.xlane.f32.xlu0 %v2074_v56  ;;  %2078 = vadd.xlane.f32.xlu1 %v2077_v57 }
0x161b   :  { %v2080_v59 = vsel %vm280_vm9, %v2072_v53, 0.0  ;;  %v2083_v5 = vsel %vm280_vm9, %v2073_v58, 0.0 }
0x161e   :  { %2081 = vadd.xlane.f32.xlu0 %v2080_v59 }
0x1622   :  { %2084 = vadd.xlane.f32.xlu0 %v2083_v5 }
0x16a7   :  { %v2076_v60 = vpop.xlane.xlu0 %2075  ;;  %v2079_v9 = vpop.xlane.xlu1 %2078 }
0x16a8   :  { %v2086_v62 = vmul.f32 0.17677669, %v2076_v60  ;;  %v2087_v3 = vmul.f32 0.17677669, %v2079_v9 }
0x16aa   :  { %v2090_v13 = vmul.f32 1.442695, %v2086_v62  ;;  %v2092_v0 = vmul.f32 1.442695, %v2087_v3 }
0x16ab   :  { %v2082_v4 = vpop.xlane.xlu0 %2081 }
0x16ac   :  { %v2088_v6 = vmul.f32 0.17677669, %v2082_v4  ;;  %4192 = vpow2.f32 %v2090_v13 }
0x16ad   :  { %4194 = vpow2.f32 %v2092_v0 }
0x16ae   :  { %v2094_v2 = vmul.f32 1.442695, %v2088_v6 }
0x16af   :  { %v2085_v43 = vpop.xlane.xlu0 %2084 }
0x16b0   :  { %v2089_v8 = vmul.f32 0.17677669, %v2085_v43  ;;  %4196 = vpow2.f32 %v2094_v2 }
0x16b2   :  { %v2096_v63 = vmul.f32 1.442695, %v2089_v8 }
0x16b4   :  { %4198 = vpow2.f32 %v2096_v63 }
0x16b6   :  { %v4193_v12 = vpop.eup %4192 }
0x16b7   :  { %v4195_v14 = vpop.eup %4194  ;;  %v2105_v28 = vrot.slane %v4193_v12, %v4561_v44 }
0x16b8   :  { %v2109_v29 = vrot.slane %v4195_v14, %v4564_v45 }
0x16ba   :  { %v4197_v21 = vpop.eup %4196  ;;  %v2110_v40 = vsel %vm243_vm3, %v2109_v29, %v2105_v28 }
0x16bb   :  { %v2114_v30 = vrot.slane %v4197_v21, %v4561_v44 }
0x16be   :  { %v4199_v31 = vpop.eup %4198 }
0x16bf   :  { %v2118_v39 = vrot.slane %v4199_v31, %v4564_v45 }
0x16c1   :  { %v2119_v1 = vsel %vm243_vm3, %v2118_v39, %v2114_v30 }
0x16c2   :  { %v2120_v41 = vsel %vm278_vm7, %v2119_v1, %v2110_v40 }
0x16c3   :  { %v2122_v46 = vsel %vm426_vm10, %v2120_v41, 0.0 }
0x16c4   :  { %2123 = vadd.xlane.f32.xlu1 %v2122_v46 }
0x1751   :  { %v2124_v47 = vpop.xlane.xlu1 %2123 }
0x1752   :  { %4200 = vrcp.f32 %v2124_v47 }
0x175c   :  { %v4201_v48 = vpop.eup %4200 }
0x175d   :  { %v2130_v36 = vrot.slane %v4201_v48, %v4637_v32  ;;  %v2134_v57 = vrot.slane %v4201_v48, %v4640_v33 }
0x175f   :  { %v2138_v53 = vmul.f32 %v4195_v14, %v2130_v36  ;;  %v2137_v56 = vmul.f32 %v4193_v12, %v2130_v36  ;;  %v2139_v58 = vmul.f32 %v4197_v21, %v2134_v57  ;;  %v2140_v59 = vmul.f32 %v4199_v31, %v2134_v57 }
0x1761   :  { %2149 = vperm.xlu1 %4126, %v2138_v53   ;;  %2146 = vperm.xlu0 %4127, %v2137_v56  }
0x1765   :  { %2152 = vperm.xlu1 %4126, %v2139_v58   ;;  %2155 = vperm.xlu0 %4127, %v2140_v59  }
0x17e0   :  { %v2150_v5 = vpop.permute.xlu1 %2149  ;;  %v2147_v60 = vpop.permute.xlu0 %2146 }
0x17e1   :  { %v2164_v9 = vrot.slane %v2150_v5, %v4564_v45  ;;  %v2160_v62 = vrot.slane %v2147_v60, %v4561_v44 }
0x17e3   :  { %v2165_v3 = vsel %vm243_vm3, %v2164_v9, %v2160_v62 }
0x17e4   :  { %v2153_v13 = vpop.permute.xlu1 %2152  ;;  %v2156_v4 = vpop.permute.xlu0 %2155  ;;  %v2190_v0 = vmul.f32 %v4876_v20, %v2165_v3  ;;  %v2189_v6 = vmul.f32 %v4882_v26, %v2165_v3  ;;  %v2191_v30 = vmul.f32 %v4913_v37, %v2165_v3  ;;  %v2192_v41 = vmul.f32 %v4927_v55, %v2165_v3 }
0x17e5   :  { %v2169_v2 = vrot.slane %v2153_v13, %v4561_v44  ;;  %v2173_v43 = vrot.slane %v2156_v4, %v4564_v45 }
0x17e6   :  { %v2200_v8 = vsel %vm189_vm0, %v2190_v0, 0.0  ;;  %v2197_v63 = vsel %vm189_vm0, %v2189_v6, 0.0  ;;  %v2203_v40 = vsel %vm189_vm0, %v2191_v30, 0.0  ;;  %v2206_v47 = vsel %vm189_vm0, %v2192_v41, 0.0 }
0x17e7   :  { %v2174_v12 = vsel %vm243_vm3, %v2173_v43, %v2169_v2  ;;  %2201 = vadd.xlane.f32.xlu0 %v2200_v8  ;;  %2198 = vadd.xlane.f32.xlu1 %v2197_v63 }
0x17e8   :  { %v2194_v14 = vmul.f32 %v4893_v35, %v2174_v12  ;;  %v2193_v21 = vmul.f32 %v4899_v38, %v2174_v12  ;;  %v2195_v31 = vmul.f32 %v4907_v42, %v2174_v12  ;;  %v2196_v1 = vmul.f32 %v4921_v52, %v2174_v12 }
0x17ea   :  { %v2212_v28 = vsel %vm189_vm0, %v2194_v14, 0.0  ;;  %v2209_v29 = vsel %vm189_vm0, %v2193_v21, 0.0  ;;  %v2215_v39 = vsel %vm189_vm0, %v2195_v31, 0.0  ;;  %v2218_v46 = vsel %vm189_vm0, %v2196_v1, 0.0 }
0x17eb   :  { %2213 = vadd.xlane.f32.xlu1 %v2212_v28  ;;  %2210 = vadd.xlane.f32.xlu0 %v2209_v29  ;;  %v2033_v29 = vld [vmem:[#allocation2 + $0x8] sm:$0x3] }
0x17ef   :  { %2216 = vadd.xlane.f32.xlu1 %v2215_v39  ;;  %2204 = vadd.xlane.f32.xlu0 %v2203_v40 }
0x17f3   :  { %2219 = vadd.xlane.f32.xlu1 %v2218_v46  ;;  %2207 = vadd.xlane.f32.xlu0 %v2206_v47 }
0x1809   :  { %1959 = vrot.lane.b32.xlu0 %v5086_v34, %s4385_s28 }
0x1874   :  { %v2199_v48 = vpop.xlane.xlu1 %2198  ;;  %v2202_v36 = vpop.xlane.xlu0 %2201 }
0x1875   :  { %v2232_v60 = vrot.slane %v2199_v48, %v4561_v44  ;;  %v2236_v9 = vrot.slane %v2202_v36, %v4564_v45 }
0x1877   :  { %v2237_v43 = vsel %vm243_vm3, %v2236_v9, %v2232_v60 }
0x1878   :  { %v2214_v53 = vpop.xlane.xlu1 %2213  ;;  %v2211_v56 = vpop.xlane.xlu0 %2210 }
0x1879   :  { %v2255_v62 = vrot.slane %v2214_v53, %v4564_v45  ;;  %v2251_v3 = vrot.slane %v2211_v56, %v4561_v44 }
0x187b   :  { %v2256_v8 = vsel %vm243_vm3, %v2255_v62, %v2251_v3 }
0x187c   :  { %v2217_v57 = vpop.xlane.xlu1 %2216  ;;  %v2205_v58 = vpop.xlane.xlu0 %2204 }
0x187d   :  { %v2260_v13 = vrot.slane %v2217_v57, %v4568_v50  ;;  %v2241_v4 = vrot.slane %v2205_v58, %v4568_v50 }
0x187f   :  { %v2261_v63 = vsel %vm250_vm5, %v2260_v13, %v2256_v8  ;;  %v2242_v12 = vsel %vm250_vm5, %v2241_v4, %v2237_v43 }
0x1880   :  { %v2208_v59 = vpop.xlane.xlu0 %2207  ;;  %v2220_v5 = vpop.xlane.xlu1 %2219 }
0x1881   :  { %v2265_v6 = vrot.slane %v2220_v5, %v4571_v51  ;;  %v2246_v2 = vrot.slane %v2208_v59, %v4571_v51 }
0x1883   :  { %v2266_v14 = vsel %vm257_vm6, %v2265_v6, %v2261_v63  ;;  %v2247_v21 = vsel %vm257_vm6, %v2246_v2, %v2242_v12 }
0x1884   :  { %v1960_v0 = vpop.permute.xlu0 %1959  ;;  %v2267_v28 = vsel %vm278_vm7, %v2266_v14, %v2247_v21 }
0x1885   :  { %3898 = vmatmul.mubr.msk.f32.vlgmr.msra.gmra.mrb[6].mxu1 %vm280_vm9, %v1960_v0 }
0x1886   :  { %4049 = vmatpush3.bf16.msra.mxu1 %v4695_v49  ;;  %3908 = vmatprep.mubr.msk.f32.mxu1 %vm4380_vm1, %v4381_v23 }
0x1887   :  { %4050 = vmatprep.subr.bf16.mxu1 %v4379_v19 }
0x188a   :  { %4052 = vmatpush3.bf16.msra.mxu1 %v4701_v54 }
0x188b   :  { %4065 = vmatprep.subr.bf16.mxu1 %v4379_v19 }
0x188d   :  { %3909 = vmatmul.mubr.msk.f32.vlgmr.msra.gmra.mrb[6].mxu1 %vm280_vm9, %v2267_v28 }
0x188e   :  { %4067 = vmatpush3.bf16.msra.mxu1 %v4536_v18  ;;  %3941 = vmatprep.mubr.msk.f32.mxu1 %vm4380_vm1, %v4381_v23 }
0x188f   :  { %4068 = vmatprep.subr.bf16.mxu1 %v4379_v19 }
0x1892   :  { %4070 = vmatpush3.bf16.msra.mxu1 %v4541_v22 }
0x1893   :  { %4071 = vmatprep.subr.bf16.mxu1 %v4379_v19 }
0x1960   :  { %v2336_v31 = vpop.f32.mrb[6].mxu1 }
0x1961   :  { %v4094_v30 = vadd.f32 %v2336_v31, %v2033_v29  ;;  %v3910_v39 = vpop.f32.mrb[7].mxu1 }
0x1963   :  { %v2342_v40 = vmul.f32 2.0, %v4094_v30 }
0x1965   :  { %v2343_v1 = vsel %vm225_vm12, %v4094_v30, %v2342_v40 }
0x1966   :  { %v3677_v41 = vmul.f32 -1.442695, %v2343_v1 }
0x1968   :  { %4202 = vpow2.f32 %v3677_v41 }
0x1972   :  { %v4203_v46 = vpop.eup %4202 }
0x1973   :  { %v2347_v47 = vadd.f32 1.0, %v4203_v46 }
0x1975   :  { %4204 = vrcp.f32 %v2347_v47 }
0x197f   :  { %v4205_v48 = vpop.eup %4204 }
0x1980   :  { %v2350_v36 = vmul.f32 2.0, %v4205_v48 }
0x1982   :  { %v3678_v53 = vadd.f32 -1.0, %v2350_v36 }
0x1984   :  { %v2352_v56 = vsel %vm225_vm12, %v4205_v48, %v3678_v53 }
0x1985   :  { %2355 = vrot.lane.b32.xlu1 %v2352_v56, %s4383_s6  ;;  %v2353_v59 = vmul.f32 %v2352_v56, %v5082_v27 }
0x19f7   :  { %v2356_v57 = vpop.permute.xlu1 %2355 }
0x19f8   :  { %v2358_v58 = vmul.f32 %v2356_v57, %v2352_v56 }
0x19fa   :  { %2360 = vrot.lane.b32.xlu1 %v2358_v58, %s4383_s6 }
0x1a6c   :  { %v2361_v5 = vpop.permute.xlu1 %2360 }
0x1a6d   :  { %v5174_v60 = vadd.f32 %v2361_v5, %v2353_v59 }
0x1a6f   :  { %4206 = vtanh.f32 %v5174_v60 }
0x1a79   :  { %v4207_v9 = vpop.eup %4206 }
0x1a7a   :  { %2366 = vrot.lane.b32.xlu0 %v4207_v9, %s4383_s6 }
0x1aec   :  { %v2367_v62 = vpop.permute.xlu0 %2366 }
0x1aed   :  { %v5178_v3 = vmul.f32 %v2367_v62, %v2352_v56 }
0x1aef   :  { %v2452_v13 = vrot.slane %v5178_v3, %v4745_v10 }
0x1af1   :  { %v2453_v4 = vcombine.high %v2452_v13, %v2452_v13  ;;  %v2460_v0 = vrot.slane %v2452_v13, %v4745_v10 }
0x1af3   :  { %v2467_v6 = vrot.slane %v2453_v4, %v4745_v10  ;;  %v2471_v27 = vrot.slane %v2460_v0, %v4637_v32 }
0x1af5   :  { %2476 = vrot.lane.b32.xlu1 %v2471_v27, %s4385_s28  ;;  %v2475_v2 = vrot.slane %v2467_v6, %v4637_v32 }
0x1af7   :  { %2478 = vrot.lane.b32.xlu0 %v2475_v2, %s4385_s28 }
0x1b67   :  { %v2477_v43 = vpop.permute.xlu1 %2476 }
0x1b68   :  { %v2482_v8 = vmul.f32 %v4987_v11, %v2477_v43  ;;  %v2483_v63 = vmul.f32 %v4993_v15, %v2477_v43 }
0x1b69   :  { %v2479_v12 = vpop.permute.xlu0 %2478 }
0x1b6a   :  { %v2484_v14 = vmul.f32 %v5007_v24, %v2479_v12  ;;  %v2485_v21 = vmul.f32 %v5001_v17, %v2479_v12  ;;  %v2486_v28 = vsel %vm280_vm9, %v2482_v8, 0.0  ;;  %v2489_v29 = vsel %vm280_vm9, %v2483_v63, 0.0 }
0x1b6b   :  { %2487 = vadd.xlane.f32.xlu1 %v2486_v28  ;;  %2490 = vadd.xlane.f32.xlu0 %v2489_v29 }
0x1b6c   :  { %v2495_v31 = vsel %vm280_vm9, %v2485_v21, 0.0  ;;  %v2492_v30 = vsel %vm280_vm9, %v2484_v14, 0.0 }
0x1b6f   :  { %2496 = vadd.xlane.f32.xlu1 %v2495_v31  ;;  %2493 = vadd.xlane.f32.xlu0 %v2492_v30 }
0x1bf8   :  { %v2488_v39 = vpop.xlane.xlu1 %2487  ;;  %v2491_v40 = vpop.xlane.xlu0 %2490 }
0x1bf9   :  { %v2498_v1 = vmul.f32 0.17677669, %v2488_v39  ;;  %v2499_v41 = vmul.f32 0.17677669, %v2491_v40 }
0x1bfb   :  { %v2502_v46 = vmul.f32 1.442695, %v2498_v1  ;;  %v2504_v47 = vmul.f32 1.442695, %v2499_v41 }
0x1bfc   :  { %v2497_v48 = vpop.xlane.xlu1 %2496  ;;  %v2494_v36 = vpop.xlane.xlu0 %2493 }
0x1bfd   :  { %4208 = vpow2.f32 %v2502_v46  ;;  %v2501_v53 = vmul.f32 0.17677669, %v2497_v48  ;;  %v2500_v56 = vmul.f32 0.17677669, %v2494_v36 }
0x1bfe   :  { %4210 = vpow2.f32 %v2504_v47 }
0x1bff   :  { %v2508_v57 = vmul.f32 1.442695, %v2501_v53  ;;  %v2506_v58 = vmul.f32 1.442695, %v2500_v56 }
0x1c01   :  { %4212 = vpow2.f32 %v2508_v57 }
0x1c02   :  { %4214 = vpow2.f32 %v2506_v58 }
0x1c07   :  { %v4209_v59 = vpop.eup %4208 }
0x1c08   :  { %v4211_v5 = vpop.eup %4210  ;;  %v2517_v62 = vrot.slane %v4209_v59, %v4561_v44 }
0x1c09   :  { %v2521_v13 = vrot.slane %v4211_v5, %v4564_v45 }
0x1c0b   :  { %v4213_v9 = vpop.eup %4212  ;;  %v2522_v27 = vsel %vm243_vm3, %v2521_v13, %v2517_v62 }
0x1c0c   :  { %v4215_v4 = vpop.eup %4214  ;;  %v2530_v0 = vrot.slane %v4213_v9, %v4564_v45 }
0x1c0d   :  { %v2526_v6 = vrot.slane %v4215_v4, %v4561_v44 }
0x1c0f   :  { %v2531_v2 = vsel %vm243_vm3, %v2530_v0, %v2526_v6 }
0x1c10   :  { %v2532_v43 = vsel %vm278_vm7, %v2531_v2, %v2522_v27 }
0x1c11   :  { %v2534_v8 = vsel %vm426_vm10, %v2532_v43, 0.0 }
0x1c12   :  { %2535 = vadd.xlane.f32.xlu0 %v2534_v8 }
0x1c9f   :  { %v2536_v63 = vpop.xlane.xlu0 %2535 }
0x1ca0   :  { %4216 = vrcp.f32 %v2536_v63 }
0x1caa   :  { %v4217_v12 = vpop.eup %4216 }
0x1cab   :  { %v2542_v14 = vrot.slane %v4217_v12, %v4637_v32  ;;  %v2546_v29 = vrot.slane %v4217_v12, %v4640_v33 }
0x1cad   :  { %v2550_v21 = vmul.f32 %v4211_v5, %v2542_v14  ;;  %v2549_v28 = vmul.f32 %v4209_v59, %v2542_v14  ;;  %v2551_v31 = vmul.f32 %v4215_v4, %v2546_v29  ;;  %v2552_v30 = vmul.f32 %v4213_v9, %v2546_v29 }
0x1caf   :  { %2561 = vperm.xlu0 %4127, %v2550_v21   ;;  %2558 = vperm.xlu1 %4126, %v2549_v28  }
0x1cb3   :  { %2564 = vperm.xlu1 %4126, %v2551_v31  }
0x1cb7   :  { %2567 = vperm.xlu1 %4126, %v2552_v30  }
0x1d2e   :  { %v2562_v39 = vpop.permute.xlu0 %2561  ;;  %v2559_v40 = vpop.permute.xlu1 %2558 }
0x1d2f   :  { %v2576_v1 = vrot.slane %v2562_v39, %v4564_v45  ;;  %v2572_v41 = vrot.slane %v2559_v40, %v4561_v44 }
0x1d31   :  { %v2577_v46 = vsel %vm243_vm3, %v2576_v1, %v2572_v41 }
0x1d32   :  { %v2565_v47 = vpop.permute.xlu1 %2564  ;;  %v2602_v48 = vmul.f32 %v4876_v20, %v2577_v46  ;;  %v2601_v36 = vmul.f32 %v4882_v26, %v2577_v46  ;;  %v2603_v57 = vmul.f32 %v4913_v37, %v2577_v46  ;;  %v2604_v62 = vmul.f32 %v4927_v55, %v2577_v46 }
0x1d33   :  { %v2581_v59 = vrot.slane %v2565_v47, %v4561_v44 }
0x1d34   :  { %v2612_v53 = vsel %vm189_vm0, %v2602_v48, 0.0  ;;  %v2609_v56 = vsel %vm189_vm0, %v2601_v36, 0.0  ;;  %v2615_v9 = vsel %vm189_vm0, %v2603_v57, 0.0  ;;  %v2618_v13 = vsel %vm189_vm0, %v2604_v62, 0.0 }
0x1d35   :  { %2613 = vadd.xlane.f32.xlu1 %v2612_v53  ;;  %2610 = vadd.xlane.f32.xlu0 %v2609_v56  ;;  %v2445_v56 = vld [vmem:[#allocation2 + $0xa] sm:$0x3] }
0x1d36   :  { %v2568_v58 = vpop.permute.xlu1 %2567 }
0x1d37   :  { %v2585_v5 = vrot.slane %v2568_v58, %v4564_v45 }
0x1d39   :  { %v2586_v20 = vsel %vm243_vm3, %v2585_v5, %v2581_v59  ;;  %2616 = vadd.xlane.f32.xlu1 %v2615_v9 }
0x1d3a   :  { %v2605_v26 = vmul.f32 %v4899_v38, %v2586_v20  ;;  %v2606_v4 = vmul.f32 %v4893_v35, %v2586_v20  ;;  %v2607_v6 = vmul.f32 %v4907_v42, %v2586_v20  ;;  %v2608_v27 = vmul.f32 %v4921_v52, %v2586_v20 }
0x1d3c   :  { %v2621_v37 = vsel %vm189_vm0, %v2605_v26, 0.0  ;;  %v2624_v0 = vsel %vm189_vm0, %v2606_v4, 0.0  ;;  %v2627_v55 = vsel %vm189_vm0, %v2607_v6, 0.0  ;;  %v2630_v38 = vsel %vm189_vm0, %v2608_v27, 0.0 }
0x1d3d   :  { %2619 = vadd.xlane.f32.xlu1 %v2618_v13  ;;  %2622 = vadd.xlane.f32.xlu0 %v2621_v37 }
0x1d41   :  { %2625 = vadd.xlane.f32.xlu0 %v2624_v0 }
0x1d45   :  { %2628 = vadd.xlane.f32.xlu0 %v2627_v55 }
0x1d49   :  { %2631 = vadd.xlane.f32.xlu0 %v2630_v38 }
0x1d4e   :  { %2371 = vrot.lane.b32.xlu1 %v5178_v3, %s4385_s28 }
0x1dc2   :  { %v2614_v2 = vpop.xlane.xlu1 %2613  ;;  %v2611_v35 = vpop.xlane.xlu0 %2610 }
0x1dc3   :  { %v2644_v52 = vrot.slane %v2611_v35, %v4561_v44  ;;  %v2648_v3 = vrot.slane %v2614_v2, %v4564_v45 }
0x1dc5   :  { %v2649_v40 = vsel %vm243_vm3, %v2648_v3, %v2644_v52 }
0x1dc6   :  { %v2617_v43 = vpop.xlane.xlu1 %2616 }
0x1dc7   :  { %v2653_v28 = vrot.slane %v2617_v43, %v4568_v50 }
0x1dc9   :  { %v2654_v46 = vsel %vm250_vm5, %v2653_v28, %v2649_v40 }
0x1dca   :  { %v2623_v8 = vpop.xlane.xlu0 %2622  ;;  %v2620_v63 = vpop.xlane.xlu1 %2619 }
0x1dcb   :  { %v2663_v31 = vrot.slane %v2623_v8, %v4561_v44  ;;  %v2658_v30 = vrot.slane %v2620_v63, %v4571_v51 }
0x1dcd   :  { %v2659_v48 = vsel %vm257_vm6, %v2658_v30, %v2654_v46 }
0x1dce   :  { %v2626_v12 = vpop.xlane.xlu0 %2625  ;;  %v5230_v14 = vpop.permute.xlu1 %2371 }
0x1dcf   :  { %3920 = vmatmul.mubr.msk.f32.vlgmr.msra.gmra.mrb[6].mxu0 %vm280_vm9, %v5230_v14  ;;  %v2667_v21 = vrot.slane %v2626_v12, %v4564_v45 }
0x1dd0   :  { %4061 = vmatpush3.bf16.msra.mxu0 %v4695_v49  ;;  %3930 = vmatprep.mubr.msk.f32.mxu0 %vm4380_vm1, %v4381_v23 }
0x1dd1   :  { %4062 = vmatprep.subr.bf16.mxu0 %v4379_v19  ;;  %v2668_v1 = vsel %vm243_vm3, %v2667_v21, %v2663_v31 }
0x1dd2   :  { %v2629_v42 = vpop.xlane.xlu0 %2628 }
0x1dd3   :  { %v2672_v29 = vrot.slane %v2629_v42, %v4568_v50 }
0x1dd4   :  { %4064 = vmatpush3.bf16.msra.mxu0 %v4701_v54 }
0x1dd5   :  { %4077 = vmatprep.subr.bf16.mxu0 %v4379_v19  ;;  %v2673_v47 = vsel %vm250_vm5, %v2672_v29, %v2668_v1 }
0x1dd6   :  { %v2632_v39 = vpop.xlane.xlu0 %2631 }
0x1dd7   :  { %v2677_v41 = vrot.slane %v2632_v39, %v4571_v51 }
0x1dd9   :  { %v2678_v36 = vsel %vm257_vm6, %v2677_v41, %v2673_v47 }
0x1dda   :  { %v2679_v53 = vsel %vm278_vm7, %v2678_v36, %v2659_v48 }
0x1ddb   :  { %3931 = vmatmul.mubr.msk.f32.vlgmr.msra.gmra.mrb[6].mxu0 %vm280_vm9, %v2679_v53 }
0x1ddc   :  { %4079 = vmatpush3.bf16.msra.mxu0 %v4536_v18  ;;  %3963 = vmatprep.mubr.msk.f32.mxu0 %vm4380_vm1, %v4381_v23 }
0x1ddd   :  { %4080 = vmatprep.subr.bf16.mxu0 %v4379_v19 }
0x1de0   :  { %4082 = vmatpush3.bf16.msra.mxu0 %v4541_v22 }
0x1de1   :  { %4083 = vmatprep.subr.bf16.mxu0 %v4379_v19 }
0x1eae   :  { %v2748_v57 = vpop.f32.mrb[6].mxu0 }
0x1eaf   :  { %v4095_v58 = vadd.f32 %v2748_v57, %v2445_v56  ;;  %v3932_v59 = vpop.f32.mrb[7].mxu0 }
0x1eb1   :  { %v2754_v5 = vmul.f32 2.0, %v4095_v58 }
0x1eb3   :  { %v2755_v9 = vsel %vm225_vm12, %v4095_v58, %v2754_v5 }
0x1eb4   :  { %v3681_v62 = vmul.f32 -1.442695, %v2755_v9 }
0x1eb6   :  { %4218 = vpow2.f32 %v3681_v62 }
0x1ec0   :  { %v4219_v18 = vpop.eup %4218 }
0x1ec1   :  { %v2759_v20 = vadd.f32 1.0, %v4219_v18 }
0x1ec3   :  { %4220 = vrcp.f32 %v2759_v20 }
0x1ecd   :  { %v4221_v26 = vpop.eup %4220 }
0x1ece   :  { %v2762_v13 = vmul.f32 2.0, %v4221_v26 }
0x1ed0   :  { %v3682_v37 = vadd.f32 -1.0, %v2762_v13 }
0x1ed2   :  { %v2764_v22 = vsel %vm225_vm12, %v4221_v26, %v3682_v37 }
0x1ed3   :  { %2767 = vrot.lane.b32.xlu0 %v2764_v22, %s4383_s6  ;;  %v2765_v6 = vmul.f32 %v2764_v22, %v5174_v60 }
0x1f45   :  { %v2768_v4 = vpop.permute.xlu0 %2767 }
0x1f46   :  { %v2770_v0 = vmul.f32 %v2768_v4, %v2764_v22 }
0x1f48   :  { %2772 = vrot.lane.b32.xlu1 %v2770_v0, %s4383_s6 }
0x1fba   :  { %v2773_v55 = vpop.permute.xlu1 %2772 }
0x1fbb   :  { %v5269_v27 = vadd.f32 %v2773_v55, %v2765_v6 }
0x1fbd   :  { %4222 = vtanh.f32 %v5269_v27 }
0x1fc7   :  { %v4223_v38 = vpop.eup %4222 }
0x1fc8   :  { %2778 = vrot.lane.b32.xlu1 %v4223_v38, %s4383_s6 }
0x203a   :  { %v2779_v2 = vpop.permute.xlu1 %2778 }
0x203b   :  { %v5273_v35 = vmul.f32 %v2779_v2, %v2764_v22 }
0x203d   :  { %v2864_v43 = vrot.slane %v5273_v35, %v4745_v10 }
0x203f   :  { %v2865_v8 = vcombine.high %v2864_v43, %v2864_v43  ;;  %v2872_v63 = vrot.slane %v2864_v43, %v4745_v10 }
0x2041   :  { %v2879_v12 = vrot.slane %v2865_v8, %v4745_v10  ;;  %v2883_v60 = vrot.slane %v2872_v63, %v4637_v32 }
0x2043   :  { %2888 = vrot.lane.b32.xlu0 %v2883_v60, %s4385_s28  ;;  %v2887_v42 = vrot.slane %v2879_v12, %v4637_v32 }
0x2045   :  { %2890 = vrot.lane.b32.xlu1 %v2887_v42, %s4385_s28 }
0x20b5   :  { %v2889_v52 = vpop.permute.xlu0 %2888 }
0x20b6   :  { %v2894_v3 = vmul.f32 %v4987_v11, %v2889_v52  ;;  %v2895_v21 = vmul.f32 %v4993_v15, %v2889_v52 }
0x20b7   :  { %v2891_v28 = vpop.permute.xlu1 %2890 }
0x20b8   :  { %v2896_v29 = vmul.f32 %v5007_v24, %v2891_v28  ;;  %v2898_v31 = vsel %vm280_vm9, %v2894_v3, 0.0  ;;  %v2901_v30 = vsel %vm280_vm9, %v2895_v21, 0.0  ;;  %v2897_v39 = vmul.f32 %v5001_v17, %v2891_v28 }
0x20b9   :  { %2899 = vadd.xlane.f32.xlu0 %v2898_v31  ;;  %2902 = vadd.xlane.f32.xlu1 %v2901_v30  ;;  %v5313_v30 = vld [vmem:[%s5514_s1] sm:$0xff] }
0x20ba   :  { %v2904_v40 = vsel %vm280_vm9, %v2896_v29, 0.0  ;;  %v2907_v1 = vsel %vm280_vm9, %v2897_v39, 0.0  ;;  %v5307_v29 = vld [vmem:[%s5514_s1 + $0x8] sm:$0xff] }
0x20bd   :  { %2905 = vadd.xlane.f32.xlu0 %v2904_v40 }
0x20c1   :  { %2908 = vadd.xlane.f32.xlu0 %v2907_v1 }
0x2146   :  { %v2900_v11 = vpop.xlane.xlu0 %2899  ;;  %v2903_v41 = vpop.xlane.xlu1 %2902 }
0x2147   :  { %v2910_v15 = vmul.f32 0.17677669, %v2900_v11  ;;  %v2911_v46 = vmul.f32 0.17677669, %v2903_v41 }
0x2149   :  { %v2914_v47 = vmul.f32 1.442695, %v2910_v15  ;;  %v2916_v48 = vmul.f32 1.442695, %v2911_v46  ;;  %v5324_v46 = vld [vmem:[%s5514_s1 + $0x28] sm:$0xff] }
0x214a   :  { %v2906_v24 = vpop.xlane.xlu0 %2905 }
0x214b   :  { %v2912_v36 = vmul.f32 0.17677669, %v2906_v24  ;;  %4224 = vpow2.f32 %v2914_v47  ;;  %v5330_v24 = vld [vmem:[%s5514_s1 + $0x20] sm:$0xff] }
0x214c   :  { %4226 = vpow2.f32 %v2916_v48 }
0x214d   :  { %v2918_v53 = vmul.f32 1.442695, %v2912_v36 }
0x214e   :  { %v2909_v56 = vpop.xlane.xlu0 %2908 }
0x214f   :  { %v2913_v57 = vmul.f32 0.17677669, %v2909_v56  ;;  %4228 = vpow2.f32 %v2918_v53  ;;  %v5338_v56 = vld [vmem:[%s5514_s1 + $0x30] sm:$0xff] }
0x2151   :  { %v2920_v17 = vmul.f32 1.442695, %v2913_v57 }
0x2153   :  { %4230 = vpow2.f32 %v2920_v17  ;;  %v5344_v17 = vld [vmem:[%s5514_s1 + $0x10] sm:$0xff] }
0x2155   :  { %v4225_v58 = vpop.eup %4224 }
0x2156   :  { %v4227_v59 = vpop.eup %4226  ;;  %v2929_v9 = vrot.slane %v4225_v58, %v4561_v44 }
0x2157   :  { %v2933_v62 = vrot.slane %v4227_v59, %v4564_v45 }
0x2159   :  { %v4229_v5 = vpop.eup %4228  ;;  %v2934_v13 = vsel %vm243_vm3, %v2933_v62, %v2929_v9  ;;  %v5352_v9 = vld [vmem:[%s5514_s1 + $0x38] sm:$0xff] }
0x215a   :  { %v2938_v20 = vrot.slane %v4229_v5, %v4561_v44 }
0x215d   :  { %v4231_v18 = vpop.eup %4230 }
0x215e   :  { %v2942_v26 = vrot.slane %v4231_v18, %v4564_v45 }
0x2160   :  { %v2943_v37 = vsel %vm243_vm3, %v2942_v26, %v2938_v20 }
0x2161   :  { %v2944_v22 = vsel %vm278_vm7, %v2943_v37, %v2934_v13 }
0x2162   :  { %v2946_v4 = vsel %vm426_vm10, %v2944_v22, 0.0 }
0x2163   :  { %2947 = vadd.xlane.f32.xlu1 %v2946_v4 }
0x21f0   :  { %v2948_v0 = vpop.xlane.xlu1 %2947 }
0x21f1   :  { %4232 = vrcp.f32 %v2948_v0 }
0x21fb   :  { %v4233_v6 = vpop.eup %4232 }
0x21fc   :  { %v2954_v55 = vrot.slane %v4233_v6, %v4637_v32  ;;  %v2958_v43 = vrot.slane %v4233_v6, %v4640_v33 }
0x21fe   :  { %v2962_v38 = vmul.f32 %v4227_v59, %v2954_v55  ;;  %v2961_v2 = vmul.f32 %v4225_v58, %v2954_v55  ;;  %v2963_v8 = vmul.f32 %v4229_v5, %v2958_v43  ;;  %v2964_v63 = vmul.f32 %v4231_v18, %v2958_v43  ;;  %v5358_v18 = vld [vmem:[%s5514_s1 + $0x18] sm:$0xff] }
0x2200   :  { %2973 = vperm.xlu1 %4126, %v2962_v38   ;;  %2970 = vperm.xlu0 %4127, %v2961_v2  }
0x2204   :  { %2976 = vperm.xlu1 %4126, %v2963_v8   ;;  %2979 = vperm.xlu0 %4127, %v2964_v63  }
0x227f   :  { %v2974_v12 = vpop.permute.xlu1 %2973  ;;  %v2971_v60 = vpop.permute.xlu0 %2970 }
0x2280   :  { %v2988_v42 = vrot.slane %v2974_v12, %v4564_v45  ;;  %v2984_v52 = vrot.slane %v2971_v60, %v4561_v44 }
0x2282   :  { %v2989_v3 = vsel %vm243_vm3, %v2988_v42, %v2984_v52 }
0x2283   :  { %v2977_v21 = vpop.permute.xlu1 %2976  ;;  %v2980_v28 = vpop.permute.xlu0 %2979  ;;  %v3014_v31 = vmul.f32 %v5307_v29, %v2989_v3  ;;  %v3013_v39 = vmul.f32 %v5313_v30, %v2989_v3  ;;  %v3015_v58 = vmul.f32 %v5344_v17, %v2989_v3  ;;  %v3016_v20 = vmul.f32 %v5358_v18, %v2989_v3 }
0x2284   :  { %v2993_v40 = vrot.slane %v2977_v21, %v4561_v44  ;;  %v2997_v1 = vrot.slane %v2980_v28, %v4564_v45 }
0x2285   :  { %v3024_v11 = vsel %vm189_vm0, %v3014_v31, 0.0  ;;  %v3021_v41 = vsel %vm189_vm0, %v3013_v39, 0.0  ;;  %v3027_v5 = vsel %vm189_vm0, %v3015_v58, 0.0  ;;  %v3030_v13 = vsel %vm189_vm0, %v3016_v20, 0.0 }
0x2286   :  { %v2998_v15 = vsel %vm243_vm3, %v2997_v1, %v2993_v40  ;;  %3025 = vadd.xlane.f32.xlu0 %v3024_v11  ;;  %3022 = vadd.xlane.f32.xlu1 %v3021_v41 }
0x2287   :  { %v3018_v47 = vmul.f32 %v5324_v46, %v2998_v15  ;;  %v3017_v48 = vmul.f32 %v5330_v24, %v2998_v15  ;;  %v3019_v57 = vmul.f32 %v5338_v56, %v2998_v15  ;;  %v3020_v62 = vmul.f32 %v5352_v9, %v2998_v15  ;;  %v2857_v15 = vld [vmem:[#allocation2 + $0xc] sm:$0x3] }
0x2289   :  { %v3036_v36 = vsel %vm189_vm0, %v3018_v47, 0.0  ;;  %v3033_v53 = vsel %vm189_vm0, %v3017_v48, 0.0  ;;  %v3039_v59 = vsel %vm189_vm0, %v3019_v57, 0.0  ;;  %v3042_v26 = vsel %vm189_vm0, %v3020_v62, 0.0 }
0x228a   :  { %3037 = vadd.xlane.f32.xlu1 %v3036_v36  ;;  %3034 = vadd.xlane.f32.xlu0 %v3033_v53 }
0x228e   :  { %3040 = vadd.xlane.f32.xlu1 %v3039_v59  ;;  %3028 = vadd.xlane.f32.xlu0 %v3027_v5 }
0x2292   :  { %3043 = vadd.xlane.f32.xlu1 %v3042_v26  ;;  %3031 = vadd.xlane.f32.xlu0 %v3030_v13 }
0x22a8   :  { %2783 = vrot.lane.b32.xlu0 %v5273_v35, %s4385_s28 }
0x2313   :  { %v3023_v37 = vpop.xlane.xlu1 %3022  ;;  %v3026_v22 = vpop.xlane.xlu0 %3025 }
0x2314   :  { %v3056_v43 = vrot.slane %v3023_v37, %v4561_v44  ;;  %v3060_v8 = vrot.slane %v3026_v22, %v4564_v45 }
0x2316   :  { %v3061_v28 = vsel %vm243_vm3, %v3060_v8, %v3056_v43 }
0x2317   :  { %v3038_v4 = vpop.xlane.xlu1 %3037  ;;  %v3035_v0 = vpop.xlane.xlu0 %3034 }
0x2318   :  { %v3079_v63 = vrot.slane %v3038_v4, %v4564_v45  ;;  %v3075_v12 = vrot.slane %v3035_v0, %v4561_v44 }
0x231a   :  { %v3080_v31 = vsel %vm243_vm3, %v3079_v63, %v3075_v12 }
0x231b   :  { %v3041_v6 = vpop.xlane.xlu1 %3040  ;;  %v3029_v55 = vpop.xlane.xlu0 %3028 }
0x231c   :  { %v3084_v60 = vrot.slane %v3041_v6, %v4568_v50  ;;  %v3065_v42 = vrot.slane %v3029_v55, %v4568_v50 }
0x231e   :  { %v3085_v39 = vsel %vm250_vm5, %v3084_v60, %v3080_v31  ;;  %v3066_v40 = vsel %vm250_vm5, %v3065_v42, %v3061_v28  ;;  %v4278_v31 = vld [vmem:[%s5515_s2 + $0x10] sm:$0xff] }
0x231f   :  { %v3032_v38 = vpop.xlane.xlu0 %3031  ;;  %v3044_v2 = vpop.xlane.xlu1 %3043 }
0x2320   :  { %v3089_v3 = vrot.slane %v3044_v2, %v4571_v51  ;;  %v3070_v21 = vrot.slane %v3032_v38, %v4571_v51 }
0x2322   :  { %v3090_v1 = vsel %vm257_vm6, %v3089_v3, %v3085_v39  ;;  %v3071_v11 = vsel %vm257_vm6, %v3070_v21, %v3066_v40  ;;  %v4277_v21 = vld [vmem:[%s5515_s2 + $0x8] sm:$0xff]  ;;  %v4279_v40 = vld [vmem:[%s5515_s2 + $0x18] sm:$0xff] }
0x2323   :  { %v2784_v52 = vpop.permute.xlu0 %2783  ;;  %v3091_v41 = vsel %vm278_vm7, %v3090_v1, %v3071_v11 }
0x2324   :  { %3942 = vmatmul.mubr.msk.f32.vlgmr.msra.gmra.mrb[8].mxu1 %vm280_vm9, %v2784_v52  ;;  %v4276_v52 = vld [vmem:[%s5515_s2] sm:$0xff]  ;;  %s4386_s2 = smov 96  }
0x2325   :  { %4073 = vmatpush3.bf16.msra.mxu1 %v4695_v49  ;;  %3952 = vmatprep.mubr.msk.f32.mxu1 %vm4380_vm1, %v4381_v23 }
0x2326   :  { %4074 = vmatprep.subr.bf16.mxu1 %v4379_v19 }
0x2329   :  { %4076 = vmatpush3.bf16.msra.mxu1 %v4701_v54 }
0x232c   :  { %3953 = vmatmul.mubr.msk.f32.vlgmr.msra.gmra.mrb[8].mxu1 %vm280_vm9, %v3091_v41 }
0x23ff   :  { %v3160_v47 = vpop.f32.mrb[8].mxu1 }
0x2400   :  { %v4096_v48 = vadd.f32 %v3160_v47, %v2857_v15  ;;  %v3954_v36 = vpop.f32.mrb[9].mxu1 }
0x2402   :  { %v3166_v53 = vmul.f32 2.0, %v4096_v48 }
0x2404   :  { %v3167_v57 = vsel %vm225_vm12, %v4096_v48, %v3166_v53 }
0x2405   :  { %v3685_v58 = vmul.f32 -1.442695, %v3167_v57 }
0x2407   :  { %4234 = vpow2.f32 %v3685_v58 }
0x2411   :  { %v4235_v59 = vpop.eup %4234 }
0x2412   :  { %v3171_v5 = vadd.f32 1.0, %v4235_v59 }
0x2414   :  { %4236 = vrcp.f32 %v3171_v5 }
0x241e   :  { %v4237_v62 = vpop.eup %4236 }
0x241f   :  { %v3174_v20 = vmul.f32 2.0, %v4237_v62 }
0x2421   :  { %v3686_v26 = vadd.f32 -1.0, %v3174_v20 }
0x2423   :  { %v3176_v13 = vsel %vm225_vm12, %v4237_v62, %v3686_v26 }
0x2424   :  { %3179 = vrot.lane.b32.xlu1 %v3176_v13, %s4383_s6  ;;  %v3177_v4 = vmul.f32 %v3176_v13, %v5269_v27 }
0x2496   :  { %v3180_v37 = vpop.permute.xlu1 %3179 }
0x2497   :  { %v3182_v22 = vmul.f32 %v3180_v37, %v3176_v13 }
0x2499   :  { %3184 = vrot.lane.b32.xlu1 %v3182_v22, %s4383_s6 }
0x250b   :  { %v3185_v0 = vpop.permute.xlu1 %3184 }
0x250c   :  { %v5394_v6 = vadd.f32 %v3185_v0, %v3177_v4 }
0x250e   :  { %4238 = vtanh.f32 %v5394_v6 }
0x2518   :  { %v4239_v55 = vpop.eup %4238 }
0x2519   :  { %3190 = vrot.lane.b32.xlu0 %v4239_v55, %s4383_s6 }
0x258b   :  { %v3191_v38 = vpop.permute.xlu0 %3190 }
0x258c   :  { %v5398_v2 = vmul.f32 %v3191_v38, %v3176_v13 }
0x258e   :  { %v3276_v43 = vrot.slane %v5398_v2, %v4745_v10 }
0x2590   :  { %v3277_v8 = vcombine.high %v3276_v43, %v3276_v43  ;;  %v3284_v63 = vrot.slane %v3276_v43, %v4745_v10 }
0x2592   :  { %v3291_v12 = vrot.slane %v3277_v8, %v4745_v10  ;;  %v3295_v27 = vrot.slane %v3284_v63, %v4637_v32 }
0x2594   :  { %3300 = vrot.lane.b32.xlu1 %v3295_v27, %s4385_s28  ;;  %v3299_v60 = vrot.slane %v3291_v12, %v4637_v32 }
0x2596   :  { %3302 = vrot.lane.b32.xlu0 %v3299_v60, %s4385_s28 }
0x2606   :  { %v3301_v42 = vpop.permute.xlu1 %3300 }
0x2607   :  { %v3306_v3 = vmul.f32 %v4276_v52, %v3301_v42  ;;  %v3307_v28 = vmul.f32 %v4277_v21, %v3301_v42 }
0x2608   :  { %v3303_v10 = vpop.permute.xlu0 %3302 }
0x2609   :  { %v3308_v39 = vmul.f32 %v4278_v31, %v3303_v10  ;;  %v3309_v1 = vmul.f32 %v4279_v40, %v3303_v10  ;;  %v3310_v11 = vsel %vm280_vm9, %v3306_v3, 0.0  ;;  %v3313_v41 = vsel %vm280_vm9, %v3307_v28, 0.0 }
0x260a   :  { %3311 = vadd.xlane.f32.xlu1 %v3310_v11  ;;  %3314 = vadd.xlane.f32.xlu0 %v3313_v41 }
0x260b   :  { %v3319_v15 = vsel %vm280_vm9, %v3309_v1, 0.0  ;;  %v3316_v47 = vsel %vm280_vm9, %v3308_v39, 0.0 }
0x260e   :  { %3320 = vadd.xlane.f32.xlu1 %v3319_v15  ;;  %3317 = vadd.xlane.f32.xlu0 %v3316_v47 }
0x2697   :  { %v3312_v48 = vpop.xlane.xlu1 %3311  ;;  %v3315_v36 = vpop.xlane.xlu0 %3314 }
0x2698   :  { %v3322_v53 = vmul.f32 0.17677669, %v3312_v48  ;;  %v3323_v57 = vmul.f32 0.17677669, %v3315_v36 }
0x269a   :  { %v3326_v58 = vmul.f32 1.442695, %v3322_v53  ;;  %v3328_v59 = vmul.f32 1.442695, %v3323_v57 }
0x269b   :  { %v3321_v5 = vpop.xlane.xlu1 %3320  ;;  %v3318_v62 = vpop.xlane.xlu0 %3317 }
0x269c   :  { %4240 = vpow2.f32 %v3326_v58  ;;  %v3325_v20 = vmul.f32 0.17677669, %v3321_v5  ;;  %v3324_v26 = vmul.f32 0.17677669, %v3318_v62 }
0x269d   :  { %4242 = vpow2.f32 %v3328_v59 }
0x269e   :  { %v3332_v13 = vmul.f32 1.442695, %v3325_v20  ;;  %v3330_v37 = vmul.f32 1.442695, %v3324_v26 }
0x26a0   :  { %4244 = vpow2.f32 %v3332_v13 }
0x26a1   :  { %4246 = vpow2.f32 %v3330_v37 }
0x26a6   :  { %v4241_v22 = vpop.eup %4240 }
0x26a7   :  { %v4243_v4 = vpop.eup %4242  ;;  %v3341_v55 = vrot.slane %v4241_v22, %v4561_v44 }
0x26a8   :  { %v3345_v38 = vrot.slane %v4243_v4, %v4564_v45 }
0x26aa   :  { %v4245_v0 = vpop.eup %4244  ;;  %v3346_v12 = vsel %vm243_vm3, %v3345_v38, %v3341_v55 }
0x26ab   :  { %v4247_v43 = vpop.eup %4246  ;;  %v3354_v8 = vrot.slane %v4245_v0, %v4564_v45 }
0x26ac   :  { %v3350_v63 = vrot.slane %v4247_v43, %v4561_v44 }
0x26ae   :  { %v3355_v27 = vsel %vm243_vm3, %v3354_v8, %v3350_v63 }
0x26af   :  { %v3356_v60 = vsel %vm278_vm7, %v3355_v27, %v3346_v12 }
0x26b0   :  { %v3358_v42 = vsel %vm426_vm10, %v3356_v60, 0.0 }
0x26b1   :  { %3359 = vadd.xlane.f32.xlu0 %v3358_v42 }
0x273e   :  { %v3360_v52 = vpop.xlane.xlu0 %3359 }
0x273f   :  { %4248 = vrcp.f32 %v3360_v52 }
0x2749   :  { %v4249_v3 = vpop.eup %4248 }
0x274a   :  { %v3366_v21 = vrot.slane %v4249_v3, %v4637_v32  ;;  %v3370_v31 = vrot.slane %v4249_v3, %v4640_v33 }
0x274c   :  { %v3374_v28 = vmul.f32 %v4243_v4, %v3366_v21  ;;  %v3373_v10 = vmul.f32 %v4241_v22, %v3366_v21  ;;  %v3375_v39 = vmul.f32 %v4247_v43, %v3370_v31  ;;  %v3376_v40 = vmul.f32 %v4245_v0, %v3370_v31 }
0x274e   :  { %3385 = vperm.xlu0 %4127, %v3374_v28   ;;  %3382 = vperm.xlu1 %4126, %v3373_v10  }
0x2752   :  { %3388 = vperm.xlu1 %4126, %v3375_v39  }
0x2756   :  { %3391 = vperm.xlu1 %4126, %v3376_v40  }
0x27cd   :  { %v3386_v1 = vpop.permute.xlu0 %3385  ;;  %v3383_v11 = vpop.permute.xlu1 %3382 }
0x27ce   :  { %v3400_v41 = vrot.slane %v3386_v1, %v4564_v45  ;;  %v3396_v15 = vrot.slane %v3383_v11, %v4561_v44 }
0x27d0   :  { %v3401_v47 = vsel %vm243_vm3, %v3400_v41, %v3396_v15 }
0x27d1   :  { %v3389_v48 = vpop.permute.xlu1 %3388  ;;  %v3426_v32 = vmul.f32 %v5307_v29, %v3401_v47  ;;  %v3425_v36 = vmul.f32 %v5313_v30, %v3401_v47  ;;  %v3427_v57 = vmul.f32 %v5344_v17, %v3401_v47  ;;  %v3428_v20 = vmul.f32 %v5358_v18, %v3401_v47 }
0x27d2   :  { %v3405_v59 = vrot.slane %v3389_v48, %v4561_v44 }
0x27d3   :  { %v3436_v33 = vsel %vm189_vm0, %v3426_v32, 0.0  ;;  %v3433_v53 = vsel %vm189_vm0, %v3425_v36, 0.0  ;;  %v3439_v62 = vsel %vm189_vm0, %v3427_v57, 0.0  ;;  %v3442_v26 = vsel %vm189_vm0, %v3428_v20, 0.0 }
0x27d4   :  { %3437 = vadd.xlane.f32.xlu1 %v3436_v33  ;;  %3434 = vadd.xlane.f32.xlu0 %v3433_v53 }
0x27d5   :  { %v3392_v58 = vpop.permute.xlu1 %3391 }
0x27d6   :  { %v3409_v5 = vrot.slane %v3392_v58, %v4564_v45 }
0x27d8   :  { %v3410_v29 = vsel %vm243_vm3, %v3409_v5, %v3405_v59  ;;  %3440 = vadd.xlane.f32.xlu1 %v3439_v62 }
0x27d9   :  { %v3429_v30 = vmul.f32 %v5330_v24, %v3410_v29  ;;  %v3430_v13 = vmul.f32 %v5324_v46, %v3410_v29  ;;  %v3431_v22 = vmul.f32 %v5338_v56, %v3410_v29  ;;  %v3432_v4 = vmul.f32 %v5352_v9, %v3410_v29 }
0x27db   :  { %v3445_v17 = vsel %vm189_vm0, %v3429_v30, 0.0  ;;  %v3448_v37 = vsel %vm189_vm0, %v3430_v13, 0.0  ;;  %v3451_v18 = vsel %vm189_vm0, %v3431_v22, 0.0  ;;  %v3454_v24 = vsel %vm189_vm0, %v3432_v4, 0.0 }
0x27dc   :  { %3443 = vadd.xlane.f32.xlu1 %v3442_v26  ;;  %3446 = vadd.xlane.f32.xlu0 %v3445_v17 }
0x27e0   :  { %3449 = vadd.xlane.f32.xlu0 %v3448_v37 }
0x27e4   :  { %3452 = vadd.xlane.f32.xlu0 %v3451_v18 }
0x27e8   :  { %3455 = vadd.xlane.f32.xlu0 %v3454_v24 }
0x27ed   :  { %3195 = vrot.lane.b32.xlu1 %v5398_v2, %s4385_s28  ;;  %s4387_s28 = smov [#allocation9]  }
0x27ee   :  { %s3646_s24 = sshll.u32 %s4387_s28, 4  ;;  %s3647_s24 = int_to_ptr.vmem [resolvable:$true] %s3646_s24 }
0x27ef   :  { %p4351_p11 = scmp.lt.s32.totalorder %s3647_s24, %s3647_s24 }
0x2861   :  { %v3438_v0 = vpop.xlane.xlu1 %3437  ;;  %v3435_v46 = vpop.xlane.xlu0 %3434 }
0x2862   :  { %v3468_v9 = vrot.slane %v3435_v46, %v4561_v44  ;;  %v3472_v12 = vrot.slane %v3438_v0, %v4564_v45 }
0x2865   :  { %v3441_v55 = vpop.xlane.xlu1 %3440 }
0x2866   :  { %v3477_v60 = vrot.slane %v3441_v55, %v4568_v50 }
0x2869   :  { %v3447_v38 = vpop.xlane.xlu0 %3446  ;;  %v3444_v43 = vpop.xlane.xlu1 %3443 }
0x286a   :  { %v3482_v52 = vrot.slane %v3444_v43, %v4571_v51 }
0x286d   :  { %v3450_v8 = vpop.xlane.xlu0 %3449  ;;  %v3196_v63 = vpop.permute.xlu1 %3195 }
0x286e   :  { %3964 = vmatmul.mubr.msk.f32.vlgmr.msra.gmra.mrb[8].mxu0 %vm280_vm9, %v3196_v63  ;;  %v3491_v27 = vrot.slane %v3450_v8, %v4564_v45 }
0x286f   :  { %4085 = vmatpush3.bf16.msra.mxu0 %v4695_v49  ;;  %3974 = vmatprep.mubr.msk.f32.mxu0 %vm4380_vm1, %v4381_v23  ;;  %v3487_v49 = vrot.slane %v3447_v38, %v4561_v44  ;;  %v3269_v44 = vld [vmem:[#allocation2 + $0xe] sm:$0x3] }
0x2870   :  { %4086 = vmatprep.subr.bf16.mxu0 %v4379_v19  ;;  %v3473_v19 = vsel %vm243_vm3, %v3472_v12, %v3468_v9 }
0x2871   :  { %v3453_v56 = vpop.xlane.xlu0 %3452  ;;  %v3492_v3 = vsel %vm243_vm3, %v3491_v27, %v3487_v49  ;;  %v3478_v28 = vsel %vm250_vm5, %v3477_v60, %v3473_v19 }
0x2872   :  { %v3496_v42 = vrot.slane %v3453_v56, %v4568_v50  ;;  %v3483_v10 = vsel %vm257_vm6, %v3482_v52, %v3478_v28 }
0x2873   :  { %4088 = vmatpush3.bf16.msra.mxu0 %v4701_v54 }
0x2874   :  { %v3497_v45 = vsel %vm250_vm5, %v3496_v42, %v3492_v3 }
0x2875   :  { %v3456_v23 = vpop.xlane.xlu0 %3455 }
0x2876   :  { %v3501_v21 = vrot.slane %v3456_v23, %v4571_v51 }
0x2878   :  { %v3502_v50 = vsel %vm257_vm6, %v3501_v21, %v3497_v45 }
0x2879   :  { %v3503_v54 = vsel %vm278_vm7, %v3502_v50, %v3483_v10 }
0x287a   :  { %3975 = vmatmul.mubr.msk.f32.vlgmr.msra.gmra.mrb[8].mxu0 %vm280_vm9, %v3503_v54 }
0x294d   :  { %v3572_v31 = vpop.f32.mrb[8].mxu0 }
0x294e   :  { %v4097_v39 = vadd.f32 %v3572_v31, %v3269_v44  ;;  %v3976_v40 = vpop.f32.mrb[9].mxu0 }
0x2950   :  { %v3578_v1 = vmul.f32 2.0, %v4097_v39 }
0x2952   :  { %v3579_v51 = vsel %vm225_vm12, %v4097_v39, %v3578_v1 }
0x2953   :  { %v3689_v11 = vmul.f32 -1.442695, %v3579_v51 }
0x2955   :  { %4250 = vpow2.f32 %v3689_v11 }
0x295f   :  { %v4251_v41 = vpop.eup %4250 }
0x2960   :  { %v3583_v15 = vadd.f32 1.0, %v4251_v41 }
0x2962   :  { %4252 = vrcp.f32 %v3583_v15 }
0x296c   :  { %v4253_v47 = vpop.eup %4252 }
0x296d   :  { %v3586_v48 = vmul.f32 2.0, %v4253_v47 }
0x296f   :  { %v3690_v32 = vadd.f32 -1.0, %v3586_v48 }
0x2971   :  { %v3588_v36 = vsel %vm225_vm12, %v4253_v47, %v3690_v32 }
0x2972   :  { %3591 = vrot.lane.b32.xlu0 %v3588_v36, %s4383_s6  ;;  %v3589_v57 = vmul.f32 %v3588_v36, %v5394_v6 }
0x2976   :  { %3607 = vrot.lane.b32.xlu0 %v4842_v7, %s4386_s2 }
0x297a   :  { %3610 = vrot.lane.b32.xlu0 %v5086_v34, %s4383_s6 }
0x29e4   :  { %v3592_v33 = vpop.permute.xlu0 %3591 }
0x29e5   :  { %v3594_v53 = vmul.f32 %v3592_v33, %v3588_v36 }
0x29e7   :  { %3596 = vrot.lane.b32.xlu1 %v3594_v53, %s4383_s6 }
0x29e8   :  { %v3608_v7 = vpop.permute.xlu0 %3607 }
0x29e9   :  { %v3621_v20 = vsel %vm280_vm9, %v4799_v16, %v3608_v7 }
0x29ea   :  { %v3622_v30 = vsel %vm105_vm11, %v3621_v20, %v4974_v61 }
0x29ec   :  { %v3611_v29 = vpop.permute.xlu0 %3610 }
0x29ed   :  { %v3624_v17 = vsel %vm3623_vm13, %v3622_v30, %v3611_v29 }
0x2a59   :  { %v3597_v58 = vpop.permute.xlu1 %3596 }
0x2a5a   :  { %v3599_v59 = vadd.f32 %v3597_v58, %v3589_v57 }
0x2a5c   :  { %4254 = vtanh.f32 %v3599_v59 }
0x2a66   :  { %v4255_v5 = vpop.eup %4254 }
0x2a67   :  { %3602 = vrot.lane.b32.xlu1 %v4255_v5, %s4383_s6 }
0x2a6b   :  { %3614 = vrot.lane.b32.xlu1 %v5273_v35, %s4386_s2 }
0x2ad9   :  { %v3603_v25 = vpop.permute.xlu1 %3602 }
0x2ada   :  { %v3605_v62 = vmul.f32 %v3603_v25, %v3588_v36 }
0x2adc   :  { %3618 = vrot.lane.b32.xlu1 %v3605_v62, %s4383_s6  ;;  %s4346_s6 = scalar_lea.vmem %s3647_s24, 64 }
0x2add   :  { %v3615_v34 = vpop.permute.xlu1 %3614  ;;  %p4347_p10 = scmp.ne.s32.totalorder %s3647_s24, %s4346_s6  ;;  %p4352_p12 = scmp.lt.s32.totalorder %s4346_s6, %s4346_s6 }
0x2ade   :  { %v3625_v6 = vsel %vm280_vm9, %v5230_v14, %v3615_v34 }
0x2adf   :  { %v3626_v35 = vsel %vm105_vm11, %v3625_v6, %v5398_v2  ;;  %p4353_p13 = por %p4352_p12, %p4351_p11 }
0x2ae1   :  { %p4354_p0 = pnand %p4353_p13, %p4347_p10 }
0x2b4e   :  { %v3619_v26 = vpop.permute.xlu1 %3618 }
0x2b4f   :  { %v3627_v13 = vsel %vm3623_vm13, %v3626_v35, %v3619_v26 }
0x2b50   :  { %v3630_v37 = vcombine.low %v3624_v17, %v3627_v13 }
0x2b52   :  { %3691 = vst.sshfl [vmem:[#allocation9] sm:$0x33 pattern:$0x76325410] %v3630_v37 }
0x2b53   :  { %4357 = shalt.err (!%p4354_p0)
}
0x2b54   :  { %s4358_s3 = scalar_lea.hbm %s5520_s7, 64 }
0x2b55   :  { %p4359_p1 = scmp.ne.s32.totalorder %s5520_s7, %s4358_s3  ;;  %p4362_p2 = scmp.lt.u32.totalorder %s4358_s3, %s5520_s7 }
0x2b57   :  { %p4364_p3 = pnand %p4362_p2, %p4359_p1 }
0x2b59   :  { %4367 = shalt.err (!%p4364_p3)
}
0x2b5a   :  { %3649 = dma.vmem_to_hbm [thread:$0]  %s3647_s24, 64, %s5520_s7, [#allocation5]  }
0x2b5b   :  { %4372 = dma.done.wait [#allocation5], 64  }
0x2b5c   :  { %4373 = vsyncadd [#allocation5], 4294967232 }
0x2b5d   :  { %3653 = vsyncpa [#allocation4], 1 }
0x2b5e   :  { %3654 = vsyncpa [#allocation7], 1 }
0x2b5f   :  { %3655 = vsyncpa [#allocation5], 1 }

</bundles_post_ra>
